<compile_context>
chip_gen: v5e
topology: v5e:2x2
jax: 0.10.0
libtpu: 0.0.40
codegen_flags: <defaults>
</compile_context>

<pallas_src>
import jax
import jax.numpy as jnp
from jax.experimental import pallas as pl
from jax.experimental.pallas import tpu as pltpu

EPS = 1e-5
TOL = 3e-2
_HI = jax.lax.Precision.HIGHEST  # reference only


# ----------------------------- Pallas kernels ------------------------------ #

def _conv_stats_kernel(p_ref, w_ref, z_ref, sum_ref, ssq_ref):
  """One big-K conv matmul per M tile + global sum / sum-of-squares accum.

  p_ref:   (TM, 9*Ci_p)   im2col patches for this tile
  w_ref:   (9*Ci_p, Co_p) packed conv weights (resident across the grid)
  z_ref:   (TM, Co_p)     raw conv output tile
  sum_ref: (1, Co_p)      per-channel sum accumulator (resident)
  ssq_ref: (1, Co_p)      per-channel sum-of-squares accumulator (resident)
  """
  z = jnp.dot(p_ref[...], w_ref[...], preferred_element_type=jnp.float32)
  z_ref[...] = z

  @pl.when(pl.program_id(0) == 0)
  def _init():
    sum_ref[...] = jnp.zeros_like(sum_ref)
    ssq_ref[...] = jnp.zeros_like(ssq_ref)

  sum_ref[...] += jnp.sum(z, axis=0, keepdims=True)
  ssq_ref[...] += jnp.sum(z * z, axis=0, keepdims=True)


def _bn_relu_kernel(z_ref, scale_ref, shift_ref, y_ref):
  """y = relu(z * scale + shift)  (folded BatchNorm + ReLU)."""
  y_ref[...] = jnp.maximum(z_ref[...] * scale_ref[...] + shift_ref[...], 0.0)


def _bn_add_relu_kernel(z_ref, scale_ref, shift_ref, xs_ref, y_ref):
  """y = relu(z * scale + shift + xs)   (identity shortcut)."""
  y = z_ref[...] * scale_ref[...] + shift_ref[...] + xs_ref[...]
  y_ref[...] = jnp.maximum(y, 0.0)


def _bn_conv1x1_add_relu_kernel(z_ref, scale_ref, shift_ref,
                                xs_ref, w3_ref, b3_ref, y_ref):
  """y = relu(z * scale + shift + xs @ w3 + b3)   (1x1-conv shortcut)."""
  short = jnp.dot(xs_ref[...], w3_ref[...],
                  preferred_element_type=jnp.float32) + b3_ref[...]
  y = z_ref[...] * scale_ref[...] + shift_ref[...] + short
  y_ref[...] = jnp.maximum(y, 0.0)


# ----------------------------- pallas_call glue ----------------------------- #

def _round_up(x, m):
  return ((x + m - 1) // m) * m


def _conv_stats(patches, w, tm, co_p):
  mp, k = patches.shape
  grid = (mp // tm,)
  z, ssum, ssq = pl.pallas_call(
      _conv_stats_kernel,
      out_shape=(jax.ShapeDtypeStruct((mp, co_p), jnp.float32),
                 jax.ShapeDtypeStruct((1, co_p), jnp.float32),
                 jax.ShapeDtypeStruct((1, co_p), jnp.float32)),
      grid=grid,
      in_specs=[pl.BlockSpec((tm, k), lambda i: (i, 0)),
                pl.BlockSpec((k, co_p), lambda i: (0, 0))],
      out_specs=(pl.BlockSpec((tm, co_p), lambda i: (i, 0)),
                 pl.BlockSpec((1, co_p), lambda i: (0, 0)),
                 pl.BlockSpec((1, co_p), lambda i: (0, 0))),
      compiler_params=pltpu.CompilerParams(
          dimension_semantics=("arbitrary",)),  # stats accumulation = reduction
  )(patches, w)
  return z, ssum, ssq


def _bn_relu(z, scale, shift, tm):
  mp, c = z.shape
  return pl.pallas_call(
      _bn_relu_kernel,
      out_shape=jax.ShapeDtypeStruct((mp, c), jnp.float32),
      grid=(mp // tm,),
      in_specs=[pl.BlockSpec((tm, c), lambda i: (i, 0)),
                pl.BlockSpec((1, c), lambda i: (0, 0)),
                pl.BlockSpec((1, c), lambda i: (0, 0))],
      out_specs=pl.BlockSpec((tm, c), lambda i: (i, 0)),
      compiler_params=pltpu.CompilerParams(
          dimension_semantics=("parallel",)),
  )(z, scale, shift)


def _bn_add_relu(z, scale, shift, xs, tm):
  mp, c = z.shape
  return pl.pallas_call(
      _bn_add_relu_kernel,
      out_shape=jax.ShapeDtypeStruct((mp, c), jnp.float32),
      grid=(mp // tm,),
      in_specs=[pl.BlockSpec((tm, c), lambda i: (i, 0)),
                pl.BlockSpec((1, c), lambda i: (0, 0)),
                pl.BlockSpec((1, c), lambda i: (0, 0)),
                pl.BlockSpec((tm, c), lambda i: (i, 0))],
      out_specs=pl.BlockSpec((tm, c), lambda i: (i, 0)),
      compiler_params=pltpu.CompilerParams(
          dimension_semantics=("parallel",)),
  )(z, scale, shift, xs)


def _bn_conv1x1_add_relu(z, scale, shift, xs, w3, b3, tm):
  mp, co_p = z.shape
  ci_p = xs.shape[1]
  return pl.pallas_call(
      _bn_conv1x1_add_relu_kernel,
      out_shape=jax.ShapeDtypeStruct((mp, co_p), jnp.float32),
      grid=(mp // tm,),
      in_specs=[pl.BlockSpec((tm, co_p), lambda i: (i, 0)),
                pl.BlockSpec((1, co_p), lambda i: (0, 0)),
                pl.BlockSpec((1, co_p), lambda i: (0, 0)),
                pl.BlockSpec((tm, ci_p), lambda i: (i, 0)),
                pl.BlockSpec((ci_p, co_p), lambda i: (0, 0)),
                pl.BlockSpec((1, co_p), lambda i: (0, 0))],
      out_specs=pl.BlockSpec((tm, co_p), lambda i: (i, 0)),
      compiler_params=pltpu.CompilerParams(
          dimension_semantics=("parallel",)),
  )(z, scale, shift, xs, w3, b3)


# ------------------------------ JAX-side glue ------------------------------- #

def _im2col_3x3(x_nhwc, stride):
  """3x3, pad=1 patches in (M, 9*C) layout (tap-major, channel-minor)."""
  n, h, w, c = x_nhwc.shape
  xp = jnp.pad(x_nhwc, ((0, 0), (1, 1), (1, 1), (0, 0)))
  ho = (h + 2 - 3) // stride + 1
  wo = (w + 2 - 3) // stride + 1
  pats = []
  for ky in range(3):
    for kx in range(3):
      p = xp[:,
             ky:ky + stride * (ho - 1) + 1:stride,
             kx:kx + stride * (wo - 1) + 1:stride, :]
      pats.append(p.reshape(n * ho * wo, c))
  return jnp.concatenate(pats, axis=-1), ho, wo


def _pack_w3x3(w_oihw, ci_p, co_p):
  """(O, I, 3, 3) -> (9*Ci_p, Co_p), matching the patch tap/channel order."""
  co, ci, _, _ = w_oihw.shape
  wt = jnp.transpose(w_oihw, (2, 3, 1, 0))                   # (3, 3, I, O)
  wt = jnp.pad(wt, ((0, 0), (0, 0), (0, ci_p - ci), (0, co_p - co)))
  return wt.reshape(9 * ci_p, co_p).astype(jnp.float32)


def _bn_scale_shift(ssum, ssq, m_true, gamma_p, beta_p):
  """Fold training-mode BatchNorm into per-channel scale/shift."""
  mean = ssum / m_true                                        # (1, C)
  var = jnp.maximum(ssq / m_true - mean * mean, 0.0)
  scale = gamma_p.reshape(1, -1) * jax.lax.rsqrt(var + EPS)
  shift = beta_p.reshape(1, -1) - mean * scale
  return scale, shift


def residual_forward(x_nchw, params, *, stride=1, use_1x1conv=False,
                     tile_m=512):
  """Pallas implementation of Residual.forward. x_nchw: (N, Cin, H, W) f32."""
  x = jnp.transpose(x_nchw, (0, 2, 3, 1)).astype(jnp.float32)  # NHWC
  n, h, w, cin = x.shape
  cout = params['w1'].shape[0]
  ci_p = _round_up(cin, 128)
  co_p = _round_up(cout, 128)

  x_p = jnp.pad(x, ((0, 0), (0, 0), (0, 0), (0, ci_p - cin)))

  # ---- stage 1: conv1 (3x3, stride) + bn1 + relu ----
  p1, ho, wo = _im2col_3x3(x_p, stride)           # (M, 9*Ci_p)
  m = n * ho * wo
  tm = _round_up(min(tile_m, m), 8)
  mp = _round_up(m, tm)
  p1 = jnp.pad(p1, ((0, mp - m), (0, 0)))
  w1 = _pack_w3x3(params['w1'], ci_p, co_p)
  z1, s1, q1 = _conv_stats(p1, w1, tm, co_p)
  g1 = jnp.pad(params['g1'], (0, co_p - cout))
  be1 = jnp.pad(params['be1'], (0, co_p - cout))
  sc1, sh1 = _bn_scale_shift(s1, q1, m, g1, be1)
  y1 = _bn_relu(z1, sc1, sh1, tm)                 # (Mp, Co_p)

  # ---- stage 2: conv2 (3x3, stride 1) + bn2 + shortcut + add + relu ----
  y1_nhwc = y1[:m].reshape(n, ho, wo, co_p)
  p2, _, _ = _im2col_3x3(y1_nhwc, 1)              # (M, 9*Co_p)
  p2 = jnp.pad(p2, ((0, mp - m), (0, 0)))
  w2 = _pack_w3x3(params['w2'], co_p, co_p)
  z2, s2, q2 = _conv_stats(p2, w2, tm, co_p)
  g2 = jnp.pad(params['g2'], (0, co_p - cout))
  be2 = jnp.pad(params['be2'], (0, co_p - cout))
  sc2, sh2 = _bn_scale_shift(s2, q2, m, g2, be2)

  if use_1x1conv:
    xs = x_p[:, ::stride, ::stride, :].reshape(m, ci_p)
    xs = jnp.pad(xs, ((0, mp - m), (0, 0)))
    w3 = params['w3'].reshape(cout, cin).T                      # (Cin, Cout)
    w3 = jnp.pad(w3, ((0, ci_p - cin), (0, co_p - cout))).astype(jnp.float32)
    b3 = jnp.pad(params['b3'], (0, co_p - cout)).reshape(1, co_p)
    out = _bn_conv1x1_add_relu(z2, sc2, sh2, xs, w3, b3, tm)
  else:
    # identity shortcut (requires Cin == Cout and stride == 1, as in PyTorch)
    xs = jnp.pad(x_p.reshape(m, ci_p), ((0, mp - m), (0, 0)))
    out = _bn_add_relu(z2, sc2, sh2, xs, tm)

  out = out[:m, :cout].reshape(n, ho, wo, cout)
  return jnp.transpose(out, (0, 3, 1, 2))         # NCHW


# --------------------------- params & reference ----------------------------- #

def init_params(key, cin, cout, use_1x1conv):
  ks = jax.random.split(key, 10)
  p = dict(
      w1=0.1 * jax.random.normal(ks[0], (cout, cin, 3, 3), jnp.float32),
      b1=0.1 * jax.random.normal(ks[1], (cout,), jnp.float32),
      w2=0.1 * jax.random.normal(ks[2], (cout, cout, 3, 3), jnp.float32),
      b2=0.1 * jax.random.normal(ks[3], (cout,), jnp.float32),
      g1=1.0 + 0.1 * jax.random.normal(ks[4], (cout,), jnp.float32),
      be1=0.1 * jax.random.normal(ks[5], (cout,), jnp.float32),
      g2=1.0 + 0.1 * jax.random.normal(ks[6], (cout,), jnp.float32),
      be2=0.1 * jax.random.normal(ks[7], (cout,), jnp.float32),
  )
  if use_1x1conv:
    p['w3'] = 0.1 * jax.random.normal(ks[8], (cout, cin, 1, 1), jnp.float32)
    p['b3'] = 0.1 * jax.random.normal(ks[9], (cout,), jnp.float32)
  return p


def _ref_residual(x, p, stride, use_1x1conv):
  """Pure-JAX reference matching PyTorch training-mode forward (f32/HIGHEST)."""
  def conv(xx, w, b, s, pad):
    y = jax.lax.conv_general_dilated(
        xx, w, (s, s), ((pad, pad), (pad, pad)),
        dimension_numbers=('NCHW', 'OIHW', 'NCHW'), precision=_HI)
    return y + b[None, :, None, None]

  def bn(xx, g, be):
    mu = jnp.mean(xx, axis=(0, 2, 3), keepdims=True)
    v = jnp.mean(jnp.square(xx - mu), axis=(0, 2, 3), keepdims=True)
    return g[None, :, None, None] * (xx - mu) / jnp.sqrt(v + EPS) \
        + be[None, :, None, None]

  y = jax.nn.relu(bn(conv(x, p['w1'], p['b1'], stride, 1), p['g1'], p['be1']))
  y = bn(conv(y, p['w2'], p['b2'], 1, 1), p['g2'], p['be2'])
  sx = conv(x, p['w3'], p['b3'], stride, 0) if use_1x1conv else x
  return jax.nn.relu(y + sx)


# ---------------------------------- main ------------------------------------ #

if __name__ == "__main__":
  key = jax.random.PRNGKey(0)
  kx, kp1, kp2 = jax.random.split(key, 3)

  # Case 1: identity shortcut, Cin == Cout, stride 1.  tile_m=128 exercises a
  # multi-tile grid (M = 2*16*16 = 512 -> 4 tiles) and the stats accumulation.
  x1 = jax.random.normal(kx, (2, 4, 16, 16), jnp.float32)
  params1 = init_params(kp1, cin=4, cout=4, use_1x1conv=False)
  out1 = residual_forward(x1, params1, stride=1, use_1x1conv=False, tile_m=128)
  out1 = jax.block_until_ready(out1)
  ref1 = _ref_residual(x1, params1, stride=1, use_1x1conv=False)
  assert out1.shape == (2, 4, 16, 16)
  assert jnp.allclose(out1, ref1, atol=TOL, rtol=TOL), "mismatch case 1"

  # Case 2: 1x1-conv shortcut, channel change 4 -> 8, stride 2.
  params2 = init_params(kp2, cin=4, cout=8, use_1x1conv=True)
  out2 = residual_forward(x1, params2, stride=2, use_1x1conv=True, tile_m=128)
  out2 = jax.block_until_ready(out2)
  ref2 = _ref_residual(x1, params2, stride=2, use_1x1conv=True)
  assert out2.shape == (2, 8, 8, 8)
  assert jnp.allclose(out2, ref2, atol=TOL, rtol=TOL), "mismatch case 2"

  print("KERNEL_OK")
</pallas_src>

<mosaic_0001>
module attributes {stable_mosaic.version = 11 : i64} {
  func.func @_conv_stats_kernel(%arg0: i32, %arg1: memref<128x1152xf32, #tpu.memory_space<vmem>>, %arg2: memref<1152x128xf32, #tpu.memory_space<vmem>>, %arg3: memref<128x128xf32, #tpu.memory_space<vmem>>, %arg4: memref<1x128xf32, #tpu.memory_space<vmem>>, %arg5: memref<1x128xf32, #tpu.memory_space<vmem>>) attributes {dimension_semantics = [#tpu.dimension_semantics<arbitrary>], iteration_bounds = array<i64: 4>, scalar_prefetch = 0 : i64, scratch_operands = 0 : i64, tpu.core_type = #tpu.core_type<tc>, window_params = [{transform_indices = @transform_0, window_bounds = array<i64: 128, 1152>}, {pipeline_mode = #tpu.pipeline_mode<synchronous>, transform_indices = @transform_1, window_bounds = array<i64: 1152, 128>}, {transform_indices = @transform_2, window_bounds = array<i64: 128, 128>}, {pipeline_mode = #tpu.pipeline_mode<synchronous>, transform_indices = @transform_3, window_bounds = array<i64: 1, 128>}, {pipeline_mode = #tpu.pipeline_mode<synchronous>, transform_indices = @transform_4, window_bounds = array<i64: 1, 128>}]} {
    %c0 = arith.constant 0 : index
    %c0_0 = arith.constant 0 : index
    %0 = vector.load %arg1[%c0, %c0_0] : memref<128x1152xf32, #tpu.memory_space<vmem>>, vector<128x1152xf32>
    %c0_1 = arith.constant 0 : index
    %c0_2 = arith.constant 0 : index
    %1 = vector.load %arg2[%c0_1, %c0_2] : memref<1152x128xf32, #tpu.memory_space<vmem>>, vector<1152x128xf32>
    %cst = arith.constant dense<0.000000e+00> : vector<128x128xf32>
    %2 = tpu.matmul %0, %1, %cst {dimension_numbers = #tpu.dot_dimension_numbers<[1], [0], [0], [1], [0, 0, 1, 1], [], []>} : vector<128x1152xf32>, vector<1152x128xf32>, vector<128x128xf32> -> vector<128x128xf32>
    %c0_3 = arith.constant 0 : index
    %c0_4 = arith.constant 0 : index
    %3 = vector.load %arg3[%c0_3, %c0_4] : memref<128x128xf32, #tpu.memory_space<vmem>>, vector<128x128xf32>
    tpu.vector_store %arg3[%c0_3, %c0_4], %2 {strides = array<i32>} : memref<128x128xf32, #tpu.memory_space<vmem>>, vector<128x128xf32>,
    %c0_i32 = arith.constant 0 : i32
    %4 = arith.cmpi eq, %arg0, %c0_i32 : i32
    %5 = arith.extui %4 : i1 to i32
    %c0_i32_5 = arith.constant 0 : i32
    %6 = arith.cmpi ne, %5, %c0_i32_5 : i32
    scf.if %6 {
      %cst_16 = arith.constant 0.000000e+00 : f32
      %18 = vector.broadcast %cst_16 : f32 to vector<1x128xf32>
      %c0_17 = arith.constant 0 : index
      %c0_18 = arith.constant 0 : index
      %19 = vector.load %arg4[%c0_17, %c0_18] : memref<1x128xf32, #tpu.memory_space<vmem>>, vector<1x128xf32>
      tpu.vector_store %arg4[%c0_17, %c0_18], %18 {strides = array<i32>} : memref<1x128xf32, #tpu.memory_space<vmem>>, vector<1x128xf32>,
      %cst_19 = arith.constant 0.000000e+00 : f32
      %20 = vector.broadcast %cst_19 : f32 to vector<1x128xf32>
      %c0_20 = arith.constant 0 : index
      %c0_21 = arith.constant 0 : index
      %21 = vector.load %arg5[%c0_20, %c0_21] : memref<1x128xf32, #tpu.memory_space<vmem>>, vector<1x128xf32>
      tpu.vector_store %arg5[%c0_20, %c0_21], %20 {strides = array<i32>} : memref<1x128xf32, #tpu.memory_space<vmem>>, vector<1x128xf32>,
    } else {
    }
    %c0_6 = arith.constant 0 : index
    %c0_7 = arith.constant 0 : index
    %7 = vector.load %arg4[%c0_6, %c0_7] : memref<1x128xf32, #tpu.memory_space<vmem>>, vector<1x128xf32>
    %cst_8 = arith.constant dense<0.000000e+00> : vector<128xf32>
    %8 = vector.multi_reduction <add>, %2, %cst_8 [0] : vector<128x128xf32> to vector<128xf32>
    %9 = vector.shape_cast %8 : vector<128xf32> to vector<1x128xf32>
    %10 = arith.addf %7, %9 : vector<1x128xf32>
    %c0_9 = arith.constant 0 : index
    %c0_10 = arith.constant 0 : index
    %11 = vector.load %arg4[%c0_9, %c0_10] : memref<1x128xf32, #tpu.memory_space<vmem>>, vector<1x128xf32>
    tpu.vector_store %arg4[%c0_9, %c0_10], %10 {strides = array<i32>} : memref<1x128xf32, #tpu.memory_space<vmem>>, vector<1x128xf32>,
    %c0_11 = arith.constant 0 : index
    %c0_12 = arith.constant 0 : index
    %12 = vector.load %arg5[%c0_11, %c0_12] : memref<1x128xf32, #tpu.memory_space<vmem>>, vector<1x128xf32>
    %13 = arith.mulf %2, %2 : vector<128x128xf32>
    %cst_13 = arith.constant dense<0.000000e+00> : vector<128xf32>
    %14 = vector.multi_reduction <add>, %13, %cst_13 [0] : vector<128x128xf32> to vector<128xf32>
    %15 = vector.shape_cast %14 : vector<128xf32> to vector<1x128xf32>
    %16 = arith.addf %12, %15 : vector<1x128xf32>
    %c0_14 = arith.constant 0 : index
    %c0_15 = arith.constant 0 : index
    %17 = vector.load %arg5[%c0_14, %c0_15] : memref<1x128xf32, #tpu.memory_space<vmem>>, vector<1x128xf32>
    tpu.vector_store %arg5[%c0_14, %c0_15], %16 {strides = array<i32>} : memref<1x128xf32, #tpu.memory_space<vmem>>, vector<1x128xf32>,
    return
  }
  func.func @transform_0(%arg0: i32) -> (i32, i32) {
    %c0_i32 = arith.constant 0 : i32
    %c0_i32_0 = arith.constant 0 : i32
    return %arg0, %c0_i32 : i32, i32
  }
  func.func @transform_1(%arg0: i32) -> (i32, i32) {
    %c0_i32 = arith.constant 0 : i32
    %c0_i32_0 = arith.constant 0 : i32
    %c0_i32_1 = arith.constant 0 : i32
    return %c0_i32, %c0_i32_0 : i32, i32
  }
  func.func @transform_2(%arg0: i32) -> (i32, i32) {
    %c0_i32 = arith.constant 0 : i32
    %c0_i32_0 = arith.constant 0 : i32
    return %arg0, %c0_i32 : i32, i32
  }
  func.func @transform_3(%arg0: i32) -> (i32, i32) {
    %c0_i32 = arith.constant 0 : i32
    %c0_i32_0 = arith.constant 0 : i32
    %c0_i32_1 = arith.constant 0 : i32
    return %c0_i32, %c0_i32_0 : i32, i32
  }
  func.func @transform_4(%arg0: i32) -> (i32, i32) {
    %c0_i32 = arith.constant 0 : i32
    %c0_i32_0 = arith.constant 0 : i32
    %c0_i32_1 = arith.constant 0 : i32
    return %c0_i32, %c0_i32_0 : i32, i32
  }
}

</mosaic_0001>

<bundles_post_ra>
// kernel: tpu_custom_call.1
= control target key start
LH: loop header
LB: loop body
LE: loop exit
PB: predicated region body
PF: predicated region fallthrough
CT: control target
= control target key end

     0   :  { %10 = vsyncpa [#allocation3], 0  ;;  %s2239_s0 = inlined_call_operand.hbm [shape: f32[512,1152], index: 0, kind: input, shape index: {}]   ;;  %s2240_s1 = inlined_call_operand.hbm [shape: f32[1152,128], index: 1, kind: input, shape index: {}]   ;;  %s2241_s2 = inlined_call_operand.hbm [shape: f32[512,128], index: 2, kind: output, shape index: {0}]   ;;  %s2242_s3 = inlined_call_operand.hbm [shape: f32[1,128], index: 3, kind: output, shape index: {1}]   ;;  %s2243_s4 = inlined_call_operand.hbm [shape: f32[1,128], index: 4, kind: output, shape index: {2}]  }
   0x1   :  { %12 = vsyncpa [#allocation3 + $0x1], 0 }
   0x2   :  { %13 = vsyncpa [#allocation6], 0 }
   0x3   :  { %14 = vsyncpa [#allocation4], 0 }
   0x4   :  { %16 = vsyncpa [#allocation4 + $0x1], 0 }
   0x5   :  { %17 = vsyncpa [#allocation9], 0  ;;  %s1716_s15 = smov 0   ;;  %s1718_s16 = smov 0  }
   0x6   :  { %s1720_s17 = smov 0   ;;  %s1722_s18 = smov 0  }
   0x7 LB: > { %s1737_s19 = sadd.s32 4294967295, %s1679_s18   ;;  %s1339_s20 = sadd.s32 4294967294, %s1679_s18   ;;  %s1679_s18 = sphi %s1722_s18, %s2258_s18   ;;  %s1675_s17 = sphi %s1720_s17, %s2257_s17   ;;  %s1671_s16 = sphi %s1718_s16, %s2256_s16   ;;  %s1667_s15 = sphi %s1716_s15, %s2255_s15  }
   0x8   : > { %p43_p0 = scmp.ne.s32.totalorder %s1671_s16, %s1667_s15  ;;  %p44_p1 = scmp.eq.s32.totalorder %s1737_s19, 0 }
   0x9   : > { %p2244_p2 = scmp.eq.s32.totalorder %s1737_s19, 3  ;;  %p94_p3 = scmp.eq.s32.totalorder %s1339_s20, 3 }
   0xa   : > { %p1746_p4 = por %p44_p1, %p43_p0  ;;  %p1340_p5 = scmp.ge.s32.totalorder %s1679_s18, 1 }
   0xb   : > { %p1751_p6 = por %p94_p3, %p43_p0  ;;  %p143_p7 = scmp.lt.s32.totalorder %s1679_s18, 5 }
   0xc   : > { %s154_s25 = sshll.u32 %s2240_s1, 4  ;;  %s1681_s27 = smov [#allocation5]   ;;  %s155_s25 = int_to_ptr.hbm [resolvable:$true] %s154_s25 }
   0xd   : > { %p1760_p9 = pnand %p1340_p5, %p143_p7  ;;  %s156_s28 = sshll.u32 %s1681_s27, 4  ;;  %s157_s28 = int_to_ptr.vmem [resolvable:$true] %s156_s28 }
   0xe   : > { %s1769_s29 = sadd.s32 1, %s1679_s18   ;;  %s1682_s30 = smov 128  }
   0xf   : > { %p1427_p10 = pneg %p1760_p9  ;;  %s1683_s5 = smov 8  }
  0x10   : > { %s27_s6 = ssub.s32 %s1679_s18, %s1769_s29  ;;  %s30_s7 = sadd.s32 1, %s1675_s17 }
  0x11   : > { %p1428_p11 = pnand %p1427_p10, %p44_p1  ;;  %p28_p12 = scmp.eq.s32.totalorder %s27_s6, 0 }
  0x12   : > { %p37_p13 = scmp.ne.s32.totalorder %s1675_s17, %s1671_s16  ;;  %p38_p0 = scmp.eq.s32.totalorder %s1679_s18, 0 }
  0x13   : > { %1430 = dma.hbm_to_vmem [thread:$0]  (!%p1428_p11), %s155_s25, 18432, %s157_s28, [#allocation6], %s1682_s30, %s1682_s30, %s1683_s5  }
  0x14   : > { %p1440_p3 = scmp.lt.s32.totalorder %s1679_s18, 4  ;;  %p39_p5 = por %p38_p0, %p37_p13 }
  0x15   : > { %s1779_s8 = scalar_select %p28_p12, %s1675_s17, %s30_s7  }
  0x16   : > { %p1783_p7 = por %p2244_p2, %p37_p13  ;;  %s170_s10 = sand.u32 1, %s1675_s17  }
  0x17   : > { %s1409_s11 = smul.u32 1152, %s1679_s18  ;;  %p1792_p10 = pnand %p1440_p3, %p39_p5 }
  0x18   : > { %s1408_s12 = smul.u32 1152, %s170_s10  ;;  %s171_s28 = scalar_lea.sflag [#allocation3], %s170_s10 }
  0x19   : > { %s180_s20 = scalar_lea.hbm %s2239_s0, %s1409_s11  ;;  %p1523_p12 = pneg %p1792_p10 }
  0x1a   : > { %s181_s24 = sshll.u32 %s180_s20, 4  ;;  %s174_s25 = scalar_lea.vmem [#allocation2], %s1408_s12  ;;  %s182_s24 = int_to_ptr.hbm [resolvable:$true] %s181_s24 }
  0x1b   : > { %s183_s27 = sshll.u32 %s174_s25, 4  ;;  %s1519_s30 = sshra.s32 %s182_s24, 4  ;;  %s184_s27 = int_to_ptr.vmem [resolvable:$true] %s183_s27  ;;  %s1520_s30 = int_to_ptr.hbm [resolvable:$true] %s1519_s30 }
  0x1c   : > { %s1521_s5 = scalar_lea.hbm %s1520_s30, 1152  ;;  %s1526_s11 = scalar_lea.hbm %s2239_s0, 4608 }
  0x1d   : > { %p1522_p11 = scmp.ne.s32.totalorder %s1520_s30, %s1521_s5  ;;  %p1527_p3 = scmp.lt.s32.totalorder %s1520_s30, %s2239_s0 }
  0x1e   : > { %p1528_p5 = scmp.lt.s32.totalorder %s1526_s11, %s1521_s5 }
  0x1f   : > { %p1524_p13 = pnand %p1523_p12, %p1522_p11 }
  0x20   : > { %p1529_p2 = por %p1528_p5, %p1527_p3 }
  0x21   : > { %p1525_p0 = pneg %p1524_p13 }
  0x23   : > { %p1530_p8 = pnand %p1529_p2, %p1525_p0 }
  0x25   : > { %1533 = shalt.err (!%p1530_p8)
}
  0x26   : > { %s1684_s10 = smov 1152   ;;  %s1685_s12 = smov 72  }
  0x27   : > { %1434 = dma.hbm_to_vmem [thread:$0]  (!%p1792_p10), %s182_s24, 18432, %s184_s27, %s171_s28, %s1684_s10, %s1684_s10, %s1685_s12  }
  0x28   : > { %195 = sbr.rel (%p1760_p9) target bundleno = 565 (0x235), region = 28  ;;  %s1809_s20 = sand.u32 (!%p1760_p9), 1, %s1671_s16  }
  0x29   : > { %s1410_s25 = smul.u32 (!%p1760_p9), 1152, %s1809_s20  ;;  %s198_s30 = scalar_lea.sflag (!%p1760_p9), [#allocation3], %s1809_s20 }
  0x2b   : > { %s1813_s5 = scalar_lea.vmem (!%p1760_p9), [#allocation2], %s1410_s25 }
  0x2d   : > { %1650 = dma.done.wait (%p1746_p4), %s198_s30, 18432  }
  0x2e   : > { %1652 = vsyncadd (%p1746_p4), %s198_s30, 4294948864 }
  0x2f   : > { %1654 = dma.done.wait (%p44_p1), [#allocation6], 18432  }
  0x30   : > { %1656 = vsyncadd (%p44_p1), [#allocation6], 4294948864  ;;  %v393_v0 = vld [vmem:[#allocation5 + $0x78] sm:$0xff]  ;;  %v392_v1 = vld [vmem:[#allocation5 + $0x70] sm:$0xff]  ;;  %s1348_s21 = sshll.u32 %s1809_s20, 7  ;;  %p2250_p1 = scmp.ne.s32.totalorder %s1737_s19, 0 }
  0x31   : > { %1360 = vmatpush.msra.mxu1 %v393_v0  ;;  %1361 = vmatpush.msra.mxu2 %v393_v0  ;;  %v391_v2 = vld [vmem:[#allocation5 + $0x68] sm:$0xff]  ;;  %v390_v3 = vld [vmem:[#allocation5 + $0x60] sm:$0xff]  ;;  %v389_v4 = vld [vmem:[#allocation5 + $0x58] sm:$0xff]  ;;  %s2058_s26 = scalar_lea.vmem [#allocation7], %s1348_s21 }
  0x32   : > { %1362 = vmatpush.msra.mxu3 %v393_v0  ;;  %522 = vmatpush.msra.mxu0 %v393_v0  ;;  %v388_v5 = vld [vmem:[#allocation5 + $0x50] sm:$0xff]  ;;  %v387_v6 = vld [vmem:[#allocation5 + $0x48] sm:$0xff]  ;;  %v386_v7 = vld [vmem:[#allocation5 + $0x40] sm:$0xff] }
  0x33   : > { %1363 = vmatpush.msra.mxu1 %v392_v1  ;;  %1364 = vmatpush.msra.mxu2 %v392_v1  ;;  %v385_v8 = vld [vmem:[#allocation5 + $0x38] sm:$0xff]  ;;  %v384_v9 = vld [vmem:[#allocation5 + $0x30] sm:$0xff]  ;;  %v383_v10 = vld [vmem:[#allocation5 + $0x28] sm:$0xff] }
  0x34   : > { %1365 = vmatpush.msra.mxu3 %v392_v1  ;;  %523 = vmatpush.msra.mxu0 %v392_v1  ;;  %v382_v11 = vld [vmem:[#allocation5 + $0x20] sm:$0xff]  ;;  %v381_v12 = vld [vmem:[#allocation5 + $0x18] sm:$0xff]  ;;  %v380_v13 = vld [vmem:[#allocation5 + $0x10] sm:$0xff] }
  0x35   : > { %1366 = vmatpush.msra.mxu1 %v391_v2  ;;  %1367 = vmatpush.msra.mxu2 %v391_v2  ;;  %v379_v14 = vld [vmem:[#allocation5 + $0x8] sm:$0xff]  ;;  %v378_v15 = vld [vmem:[#allocation5] sm:$0xff]  ;;  %v425_v18 = vld [vmem:[#allocation5 + $0x178] sm:$0xff] }
  0x36   : > { %1368 = vmatpush.msra.mxu3 %v391_v2  ;;  %524 = vmatpush.msra.mxu0 %v391_v2  ;;  %v270_v16 = vld [vmem:[%s1813_s5 + $0x120] sm:$0xff]  ;;  %v409_v19 = vld [vmem:[#allocation5 + $0xf8] sm:$0xff]  ;;  %v424_v21 = vld [vmem:[#allocation5 + $0x170] sm:$0xff] }
  0x37   : > { %1369 = vmatpush.msra.mxu1 %v390_v3  ;;  %1370 = vmatpush.msra.mxu2 %v390_v3  ;;  %v306_v17 = vld [vmem:[%s1813_s5 + $0x240] sm:$0xff]  ;;  %v441_v22 = vld [vmem:[#allocation5 + $0x1f8] sm:$0xff]  ;;  %v408_v23 = vld [vmem:[#allocation5 + $0xf0] sm:$0xff] }
  0x38   : > { %1371 = vmatpush.msra.mxu3 %v390_v3  ;;  %525 = vmatpush.msra.mxu0 %v390_v3  ;;  %v342_v20 = vld [vmem:[%s1813_s5 + $0x360] sm:$0xff]  ;;  %v423_v24 = vld [vmem:[#allocation5 + $0x168] sm:$0xff]  ;;  %v440_v25 = vld [vmem:[#allocation5 + $0x1f0] sm:$0xff] }
  0x39   : > { %1372 = vmatpush.msra.mxu1 %v389_v4  ;;  %1373 = vmatpush.msra.mxu2 %v389_v4  ;;  %v407_v26 = vld [vmem:[#allocation5 + $0xe8] sm:$0xff]  ;;  %v234_v27 = vld [vmem:[%s1813_s5] sm:$0xff]  ;;  %v421_v33 = vld [vmem:[#allocation5 + $0x158] sm:$0xff] }
  0x3a   : > { %1374 = vmatpush.msra.mxu3 %v389_v4  ;;  %526 = vmatpush.msra.mxu0 %v389_v4  ;;  %v422_v28 = vld [vmem:[#allocation5 + $0x160] sm:$0xff]  ;;  %v439_v29 = vld [vmem:[#allocation5 + $0x1e8] sm:$0xff]  ;;  %v405_v35 = vld [vmem:[#allocation5 + $0xd8] sm:$0xff] }
  0x3b   : > { %1375 = vmatpush.msra.mxu1 %v388_v5  ;;  %1376 = vmatpush.msra.mxu2 %v388_v5  ;;  %v406_v30 = vld [vmem:[#allocation5 + $0xe0] sm:$0xff]  ;;  %v315_v31 = vld [vmem:[%s1813_s5 + $0x288] sm:$0xff]  ;;  %v420_v37 = vld [vmem:[#allocation5 + $0x150] sm:$0xff] }
  0x3c   : > { %1377 = vmatpush.msra.mxu3 %v388_v5  ;;  %527 = vmatpush.msra.mxu0 %v388_v5  ;;  %v279_v32 = vld [vmem:[%s1813_s5 + $0x168] sm:$0xff]  ;;  %v438_v34 = vld [vmem:[#allocation5 + $0x1e0] sm:$0xff]  ;;  %v437_v38 = vld [vmem:[#allocation5 + $0x1d8] sm:$0xff] }
  0x3d   : > { %1378 = vmatpush.msra.mxu1 %v387_v6  ;;  %1379 = vmatpush.msra.mxu2 %v387_v6  ;;  %v351_v36 = vld [vmem:[%s1813_s5 + $0x3a8] sm:$0xff]  ;;  %v457_v39 = vld [vmem:[#allocation5 + $0x278] sm:$0xff]  ;;  %v404_v40 = vld [vmem:[#allocation5 + $0xd0] sm:$0xff] }
  0x3e   : > { %1380 = vmatpush.msra.mxu3 %v387_v6  ;;  %528 = vmatpush.msra.mxu0 %v387_v6  ;;  %v419_v41 = vld [vmem:[#allocation5 + $0x148] sm:$0xff]  ;;  %v436_v42 = vld [vmem:[#allocation5 + $0x1d0] sm:$0xff]  ;;  %v418_v45 = vld [vmem:[#allocation5 + $0x140] sm:$0xff] }
  0x3f   : > { %1381 = vmatpush.msra.mxu1 %v386_v7  ;;  %1382 = vmatpush.msra.mxu2 %v386_v7  ;;  %v456_v43 = vld [vmem:[#allocation5 + $0x270] sm:$0xff]  ;;  %v403_v44 = vld [vmem:[#allocation5 + $0xc8] sm:$0xff]  ;;  %v402_v48 = vld [vmem:[#allocation5 + $0xc0] sm:$0xff] }
  0x40   : > { %1383 = vmatpush.msra.mxu3 %v386_v7  ;;  %529 = vmatpush.msra.mxu0 %v386_v7  ;;  %v435_v46 = vld [vmem:[#allocation5 + $0x1c8] sm:$0xff]  ;;  %v324_v49 = vld [vmem:[%s1813_s5 + $0x2d0] sm:$0xff]  ;;  %v417_v51 = vld [vmem:[#allocation5 + $0x138] sm:$0xff] }
  0x41   : > { %1384 = vmatpush.msra.mxu1 %v385_v8  ;;  %1385 = vmatpush.msra.mxu2 %v385_v8  ;;  %v455_v47 = vld [vmem:[#allocation5 + $0x268] sm:$0xff]  ;;  %v288_v50 = vld [vmem:[%s1813_s5 + $0x1b0] sm:$0xff]  ;;  %v434_v52 = vld [vmem:[#allocation5 + $0x1c0] sm:$0xff] }
  0x42   : > { %1386 = vmatpush.msra.mxu3 %v385_v8  ;;  %530 = vmatpush.msra.mxu0 %v385_v8  ;;  %v454_v53 = vld [vmem:[#allocation5 + $0x260] sm:$0xff]  ;;  %v401_v54 = vld [vmem:[#allocation5 + $0xb8] sm:$0xff]  ;;  %v243_v55 = vld [vmem:[%s1813_s5 + $0x48] sm:$0xff] }
  0x43   : > { %1387 = vmatpush.msra.mxu1 %v384_v9  ;;  %1388 = vmatpush.msra.mxu2 %v384_v9  ;;  %v360_v56 = vld [vmem:[%s1813_s5 + $0x3f0] sm:$0xff]  ;;  %v433_v58 = vld [vmem:[#allocation5 + $0x1b8] sm:$0xff]  ;;  %v415_v61 = vld [vmem:[#allocation5 + $0x128] sm:$0xff] }
  0x44   : > { %1389 = vmatpush.msra.mxu3 %v384_v9  ;;  %531 = vmatpush.msra.mxu0 %v384_v9  ;;  %v416_v57 = vld [vmem:[#allocation5 + $0x130] sm:$0xff]  ;;  %v453_v59 = vld [vmem:[#allocation5 + $0x258] sm:$0xff]  ;;  %v399_v0 = vld [vmem:[#allocation5 + $0xa8] sm:$0xff] }
  0x45   : > { %1390 = vmatpush.msra.mxu1 %v383_v10  ;;  %1391 = vmatpush.msra.mxu2 %v383_v10  ;;  %v400_v60 = vld [vmem:[#allocation5 + $0xb0] sm:$0xff]  ;;  %v414_v1 = vld [vmem:[#allocation5 + $0x120] sm:$0xff]  ;;  %v431_v2 = vld [vmem:[#allocation5 + $0x1a8] sm:$0xff] }
  0x46   : > { %1392 = vmatpush.msra.mxu3 %v383_v10  ;;  %532 = vmatpush.msra.mxu0 %v383_v10  ;;  %v432_v62 = vld [vmem:[#allocation5 + $0x1b0] sm:$0xff]  ;;  %v451_v3 = vld [vmem:[#allocation5 + $0x248] sm:$0xff]  ;;  %v398_v4 = vld [vmem:[#allocation5 + $0xa0] sm:$0xff] }
  0x47   : > { %1393 = vmatpush.msra.mxu1 %v382_v11  ;;  %1394 = vmatpush.msra.mxu2 %v382_v11  ;;  %v452_v63 = vld [vmem:[#allocation5 + $0x250] sm:$0xff]  ;;  %v333_v5 = vld [vmem:[%s1813_s5 + $0x318] sm:$0xff]  ;;  %v430_v8 = vld [vmem:[#allocation5 + $0x1a0] sm:$0xff] }
  0x48   : > { %1395 = vmatpush.msra.mxu3 %v382_v11  ;;  %533 = vmatpush.msra.mxu0 %v382_v11  ;;  %v297_v6 = vld [vmem:[%s1813_s5 + $0x1f8] sm:$0xff]  ;;  %v450_v9 = vld [vmem:[#allocation5 + $0x240] sm:$0xff]  ;;  %v252_v11 = vld [vmem:[%s1813_s5 + $0x90] sm:$0xff] }
  0x49   : > { %1396 = vmatpush.msra.mxu1 %v381_v12  ;;  %1397 = vmatpush.msra.mxu2 %v381_v12  ;;  %v413_v7 = vld [vmem:[#allocation5 + $0x118] sm:$0xff] }
  0x4a   : > { %1398 = vmatpush.msra.mxu3 %v381_v12  ;;  %534 = vmatpush.msra.mxu0 %v381_v12  ;;  %v397_v10 = vld [vmem:[#allocation5 + $0x98] sm:$0xff] }
  0x4b   : > { %1399 = vmatpush.msra.mxu1 %v380_v13  ;;  %1400 = vmatpush.msra.mxu2 %v380_v13  ;;  %v369_v12 = vld [vmem:[%s1813_s5 + $0x438] sm:$0xff] }
  0x4c   : > { %1401 = vmatpush.msra.mxu3 %v380_v13  ;;  %535 = vmatpush.msra.mxu0 %v380_v13  ;;  %v412_v13 = vld [vmem:[#allocation5 + $0x110] sm:$0xff] }
  0x4d   : > { %1402 = vmatpush.msra.mxu1 %v379_v14  ;;  %1403 = vmatpush.msra.mxu2 %v379_v14 }
  0x4e   : > { %1404 = vmatpush.msra.mxu3 %v379_v14  ;;  %536 = vmatpush.msra.mxu0 %v379_v14  ;;  %v429_v14 = vld [vmem:[#allocation5 + $0x198] sm:$0xff] }
  0x4f   : > { %1405 = vmatpush.msra.mxu1 %v378_v15  ;;  %1406 = vmatpush.msra.mxu2 %v378_v15 }
  0x50   : > { %550 = vmatmul.f32.vlgmr.msra.gmra.mxu1 %v270_v16  ;;  %562 = vmatmul.f32.vlgmr.msra.gmra.mxu2 %v306_v17  ;;  %v396_v16 = vld [vmem:[#allocation5 + $0x90] sm:$0xff]  ;;  %v411_v17 = vld [vmem:[#allocation5 + $0x108] sm:$0xff] }
  0x51   : > { %652 = vmatpush.msrb.mxu2 %v425_v18  ;;  %1407 = vmatpush.msra.mxu3 %v378_v15  ;;  %v428_v18 = vld [vmem:[#allocation5 + $0x190] sm:$0xff] }
  0x52   : > { %587 = vmatpush.msrb.mxu1 %v409_v19  ;;  %574 = vmatmul.f32.vlgmr.msra.gmra.mxu3 %v342_v20  ;;  %v448_v19 = vld [vmem:[#allocation5 + $0x230] sm:$0xff]  ;;  %v395_v20 = vld [vmem:[#allocation5 + $0x88] sm:$0xff] }
  0x53   : > { %653 = vmatpush.msrb.mxu2 %v424_v21  ;;  %717 = vmatpush.msrb.mxu3 %v441_v22  ;;  %v410_v21 = vld [vmem:[#allocation5 + $0x100] sm:$0xff]  ;;  %v427_v22 = vld [vmem:[#allocation5 + $0x188] sm:$0xff] }
  0x54   : > { %588 = vmatpush.msrb.mxu1 %v408_v23  ;;  %537 = vmatpush.msra.mxu0 %v378_v15  ;;  %v449_v15 = vld [vmem:[#allocation5 + $0x238] sm:$0xff]  ;;  %v447_v23 = vld [vmem:[#allocation5 + $0x228] sm:$0xff] }
  0x55   : > { %654 = vmatpush.msrb.mxu2 %v423_v24  ;;  %718 = vmatpush.msrb.mxu3 %v440_v25  ;;  %v394_v24 = vld [vmem:[#allocation5 + $0x80] sm:$0xff]  ;;  %v236_v25 = vld [vmem:[%s1813_s5 + $0x10] sm:$0xff] }
  0x56   : > { %589 = vmatpush.msrb.mxu1 %v407_v26  ;;  %538 = vmatmul.f32.vlgmr.msra.gmra.mxu0 %v234_v27  ;;  %v235_v26 = vld [vmem:[%s1813_s5 + $0x8] sm:$0xff]  ;;  %v426_v27 = vld [vmem:[#allocation5 + $0x180] sm:$0xff] }
  0x57   : > { %655 = vmatpush.msrb.mxu2 %v422_v28  ;;  %719 = vmatpush.msrb.mxu3 %v439_v29  ;;  %v446_v28 = vld [vmem:[#allocation5 + $0x220] sm:$0xff]  ;;  %v489_v29 = vld [vmem:[#allocation5 + $0x378] sm:$0xff] }
  0x58   : > { %590 = vmatpush.msrb.mxu1 %v406_v30  ;;  %565 = vmatmul.f32.gmra.mxu2 %v315_v31  ;;  %v261_v30 = vld [vmem:[%s1813_s5 + $0xd8] sm:$0xff] }
  0x59   : > { %553 = vmatmul.f32.gmra.mxu1 %v279_v32  ;;  %656 = vmatpush.msrb.mxu2 %v421_v33  ;;  %v237_v31 = vld [vmem:[%s1813_s5 + $0x18] sm:$0xff] }
  0x5a   : > { %720 = vmatpush.msrb.mxu3 %v438_v34  ;;  %591 = vmatpush.msrb.mxu1 %v405_v35  ;;  %v445_v32 = vld [vmem:[#allocation5 + $0x218] sm:$0xff]  ;;  %v488_v35 = vld [vmem:[#allocation5 + $0x370] sm:$0xff] }
  0x5b   : > { %577 = vmatmul.f32.gmra.mxu3 %v351_v36  ;;  %657 = vmatpush.msrb.mxu2 %v420_v37  ;;  %v505_v33 = vld [vmem:[#allocation5 + $0x3f8] sm:$0xff]  ;;  %v444_v36 = vld [vmem:[#allocation5 + $0x210] sm:$0xff] }
  0x5c   : > { %721 = vmatpush.msrb.mxu3 %v437_v38  ;;  %782 = vmatpush.msrb.mxu0 %v457_v39  ;;  %v473_v34 = vld [vmem:[#allocation5 + $0x2f8] sm:$0xff]  ;;  %v504_v37 = vld [vmem:[#allocation5 + $0x3f0] sm:$0xff]  ;;  %v487_v39 = vld [vmem:[#allocation5 + $0x368] sm:$0xff] }
  0x5d   : > { %592 = vmatpush.msrb.mxu1 %v404_v40  ;;  %658 = vmatpush.msrb.mxu2 %v419_v41  ;;  %v472_v38 = vld [vmem:[#allocation5 + $0x2f0] sm:$0xff]  ;;  %v443_v40 = vld [vmem:[#allocation5 + $0x208] sm:$0xff]  ;;  %v245_v41 = vld [vmem:[%s1813_s5 + $0x58] sm:$0xff] }
  0x5e   : > { %722 = vmatpush.msrb.mxu3 %v436_v42  ;;  %783 = vmatpush.msrb.mxu0 %v456_v43  ;;  %v244_v42 = vld [vmem:[%s1813_s5 + $0x50] sm:$0xff]  ;;  %v503_v43 = vld [vmem:[#allocation5 + $0x3e8] sm:$0xff] }
  0x5f   : > { %593 = vmatpush.msrb.mxu1 %v403_v44  ;;  %659 = vmatpush.msrb.mxu2 %v418_v45  ;;  %v442_v44 = vld [vmem:[#allocation5 + $0x200] sm:$0xff]  ;;  %v471_v45 = vld [vmem:[#allocation5 + $0x2e8] sm:$0xff] }
  0x60   : > { %723 = vmatpush.msrb.mxu3 %v435_v46  ;;  %784 = vmatpush.msrb.mxu0 %v455_v47  ;;  %v246_v46 = vld [vmem:[%s1813_s5 + $0x60] sm:$0xff] }
  0x61   : > { %594 = vmatpush.msrb.mxu1 %v402_v48  ;;  %568 = vmatmul.f32.gmra.mxu2 %v324_v49  ;;  %v238_v47 = vld [vmem:[%s1813_s5 + $0x20] sm:$0xff]  ;;  %v521_v48 = vld [vmem:[#allocation5 + $0x478] sm:$0xff] }
  0x62   : > { %556 = vmatmul.f32.gmra.mxu1 %v288_v50  ;;  %660 = vmatpush.msrb.mxu2 %v417_v51  ;;  %v486_v49 = vld [vmem:[#allocation5 + $0x360] sm:$0xff] }
  0x63   : > { %724 = vmatpush.msrb.mxu3 %v434_v52  ;;  %785 = vmatpush.msrb.mxu0 %v454_v53  ;;  %v502_v50 = vld [vmem:[#allocation5 + $0x3e0] sm:$0xff]  ;;  %v520_v52 = vld [vmem:[#allocation5 + $0x470] sm:$0xff]  ;;  %v485_v53 = vld [vmem:[#allocation5 + $0x358] sm:$0xff] }
  0x64   : > { %595 = vmatpush.msrb.mxu1 %v401_v54  ;;  %541 = vmatmul.f32.gmra.mxu0 %v243_v55  ;;  %v470_v51 = vld [vmem:[#allocation5 + $0x2e0] sm:$0xff]  ;;  %v501_v54 = vld [vmem:[#allocation5 + $0x3d8] sm:$0xff] }
  0x65   : > { %580 = vmatmul.f32.gmra.mxu3 %v360_v56  ;;  %661 = vmatpush.msrb.mxu2 %v416_v57  ;;  %v469_v55 = vld [vmem:[#allocation5 + $0x2d8] sm:$0xff]  ;;  %v254_v56 = vld [vmem:[%s1813_s5 + $0xa0] sm:$0xff]  ;;  %v519_v57 = vld [vmem:[#allocation5 + $0x468] sm:$0xff] }
  0x66   : > { %725 = vmatpush.msrb.mxu3 %v433_v58  ;;  %786 = vmatpush.msrb.mxu0 %v453_v59  ;;  %v253_v58 = vld [vmem:[%s1813_s5 + $0x98] sm:$0xff]  ;;  %v484_v59 = vld [vmem:[#allocation5 + $0x350] sm:$0xff] }
  0x67   : > { %596 = vmatpush.msrb.mxu1 %v400_v60  ;;  %662 = vmatpush.msrb.mxu2 %v415_v61  ;;  %v518_v60 = vld [vmem:[#allocation5 + $0x460] sm:$0xff]  ;;  %v500_v61 = vld [vmem:[#allocation5 + $0x3d0] sm:$0xff] }
  0x68   : > { %726 = vmatpush.msrb.mxu3 %v432_v62  ;;  %787 = vmatpush.msrb.mxu0 %v452_v63  ;;  %v255_v62 = vld [vmem:[%s1813_s5 + $0xa8] sm:$0xff] }
  0x69   : > { %597 = vmatpush.msrb.mxu1 %v399_v0  ;;  %663 = vmatpush.msrb.mxu2 %v414_v1  ;;  %v247_v63 = vld [vmem:[%s1813_s5 + $0x68] sm:$0xff]  ;;  %v517_v0 = vld [vmem:[#allocation5 + $0x458] sm:$0xff]  ;;  %v468_v1 = vld [vmem:[#allocation5 + $0x2d0] sm:$0xff] }
  0x6a   : > { %727 = vmatpush.msrb.mxu3 %v431_v2  ;;  %788 = vmatpush.msrb.mxu0 %v451_v3  ;;  %v483_v2 = vld [vmem:[#allocation5 + $0x348] sm:$0xff] }
  0x6b   : > { %598 = vmatpush.msrb.mxu1 %v398_v4  ;;  %571 = vmatmul.f32.gmra.mxu2 %v333_v5  ;;  %v499_v3 = vld [vmem:[#allocation5 + $0x3c8] sm:$0xff]  ;;  %v516_v4 = vld [vmem:[#allocation5 + $0x450] sm:$0xff] }
  0x6c   : > { %559 = vmatmul.f32.gmra.mxu1 %v297_v6  ;;  %664 = vmatpush.msrb.mxu2 %v413_v7  ;;  %v467_v5 = vld [vmem:[#allocation5 + $0x2c8] sm:$0xff]  ;;  %v262_v7 = vld [vmem:[%s1813_s5 + $0xe0] sm:$0xff] }
  0x6d   : > { %728 = vmatpush.msrb.mxu3 %v430_v8  ;;  %789 = vmatpush.msrb.mxu0 %v450_v9  ;;  %v263_v6 = vld [vmem:[%s1813_s5 + $0xe8] sm:$0xff]  ;;  %v264_v8 = vld [vmem:[%s1813_s5 + $0xf0] sm:$0xff] }
  0x6e   : > { %599 = vmatpush.msrb.mxu1 %v397_v10  ;;  %544 = vmatmul.f32.gmra.mxu0 %v252_v11  ;;  %v256_v9 = vld [vmem:[%s1813_s5 + $0xb0] sm:$0xff]  ;;  %v482_v10 = vld [vmem:[#allocation5 + $0x340] sm:$0xff] }
  0x6f   : > { %583 = vmatmul.f32.gmra.mxu3 %v369_v12  ;;  %665 = vmatpush.msrb.mxu2 %v412_v13  ;;  %v498_v11 = vld [vmem:[#allocation5 + $0x3c0] sm:$0xff]  ;;  %v515_v12 = vld [vmem:[#allocation5 + $0x448] sm:$0xff] }
  0x70   : > { %729 = vmatpush.msrb.mxu3 %v429_v14  ;;  %790 = vmatpush.msrb.mxu0 %v449_v15  ;;  %v466_v13 = vld [vmem:[#allocation5 + $0x2c0] sm:$0xff]  ;;  %v272_v14 = vld [vmem:[%s1813_s5 + $0x130] sm:$0xff]  ;;  %v271_v15 = vld [vmem:[%s1813_s5 + $0x128] sm:$0xff] }
  0x71   : > { %600 = vmatpush.msrb.mxu1 %v396_v16  ;;  %666 = vmatpush.msrb.mxu2 %v411_v17  ;;  %v273_v16 = vld [vmem:[%s1813_s5 + $0x138] sm:$0xff] }
  0x72   : > { %730 = vmatpush.msrb.mxu3 %v428_v18  ;;  %791 = vmatpush.msrb.mxu0 %v448_v19  ;;  %v265_v17 = vld [vmem:[%s1813_s5 + $0xf8] sm:$0xff] }
  0x73   : > { %601 = vmatpush.msrb.mxu1 %v395_v20  ;;  %667 = vmatpush.msrb.mxu2 %v410_v21  ;;  %v481_v18 = vld [vmem:[#allocation5 + $0x338] sm:$0xff]  ;;  %v514_v20 = vld [vmem:[#allocation5 + $0x440] sm:$0xff] }
  0x74   : > { %731 = vmatpush.msrb.mxu3 %v427_v22  ;;  %792 = vmatpush.msrb.mxu0 %v447_v23  ;;  %v497_v19 = vld [vmem:[#allocation5 + $0x3b8] sm:$0xff]  ;;  %v280_v23 = vld [vmem:[%s1813_s5 + $0x170] sm:$0xff] }
  0x75   : > { %602 = vmatpush.msrb.mxu1 %v394_v24  ;;  %668 = vmatmul.f32.vlgmr.msrb.gmra.mxu2 %v236_v25  ;;  %v465_v21 = vld [vmem:[#allocation5 + $0x2b8] sm:$0xff]  ;;  %v282_v24 = vld [vmem:[%s1813_s5 + $0x180] sm:$0xff] }
  0x76   : > { %603 = vmatmul.f32.vlgmr.msrb.gmra.mxu1 %v235_v26  ;;  %732 = vmatpush.msrb.mxu3 %v426_v27  ;;  %v281_v22 = vld [vmem:[%s1813_s5 + $0x178] sm:$0xff]  ;;  %v274_v25 = vld [vmem:[%s1813_s5 + $0x140] sm:$0xff]  ;;  %v480_v26 = vld [vmem:[#allocation5 + $0x330] sm:$0xff] }
  0x77   : > { %793 = vmatpush.msrb.mxu0 %v446_v28  ;;  %912 = vmatpush.msra.mxu2 %v489_v29  ;;  %v496_v27 = vld [vmem:[#allocation5 + $0x3b0] sm:$0xff]  ;;  %v513_v28 = vld [vmem:[#allocation5 + $0x438] sm:$0xff] }
  0x78   : > { %547 = vmatmul.f32.gmra.mxu0 %v261_v30  ;;  %733 = vmatmul.f32.vlgmr.msrb.gmra.mxu3 %v237_v31  ;;  %v464_v29 = vld [vmem:[#allocation5 + $0x2b0] sm:$0xff]  ;;  %v290_v30 = vld [vmem:[%s1813_s5 + $0x1c0] sm:$0xff]  ;;  %v289_v31 = vld [vmem:[%s1813_s5 + $0x1b8] sm:$0xff] }
  0x79   : > { %794 = vmatpush.msrb.mxu0 %v445_v32  ;;  %977 = vmatpush.msra.mxu3 %v505_v33  ;;  %v291_v32 = vld [vmem:[%s1813_s5 + $0x1c8] sm:$0xff] }
  0x7a   : > { %847 = vmatpush.msra.mxu1 %v473_v34  ;;  %913 = vmatpush.msra.mxu2 %v488_v35  ;;  %v283_v33 = vld [vmem:[%s1813_s5 + $0x188] sm:$0xff] }
  0x7b   : > { %795 = vmatpush.msrb.mxu0 %v444_v36  ;;  %978 = vmatpush.msra.mxu3 %v504_v37  ;;  %v479_v34 = vld [vmem:[#allocation5 + $0x328] sm:$0xff]  ;;  %v512_v36 = vld [vmem:[#allocation5 + $0x430] sm:$0xff] }
  0x7c   : > { %848 = vmatpush.msra.mxu1 %v472_v38  ;;  %914 = vmatpush.msra.mxu2 %v487_v39  ;;  %v495_v35 = vld [vmem:[#allocation5 + $0x3a8] sm:$0xff]  ;;  %v298_v39 = vld [vmem:[%s1813_s5 + $0x200] sm:$0xff] }
  0x7d   : > { %796 = vmatpush.msrb.mxu0 %v443_v40  ;;  %671 = vmatmul.f32.gmra.mxu2 %v245_v41  ;;  %v463_v37 = vld [vmem:[#allocation5 + $0x2a8] sm:$0xff]  ;;  %v300_v40 = vld [vmem:[%s1813_s5 + $0x210] sm:$0xff] }
  0x7e   : > { %606 = vmatmul.f32.gmra.mxu1 %v244_v42  ;;  %979 = vmatpush.msra.mxu3 %v503_v43  ;;  %v299_v38 = vld [vmem:[%s1813_s5 + $0x208] sm:$0xff]  ;;  %v292_v41 = vld [vmem:[%s1813_s5 + $0x1d0] sm:$0xff]  ;;  %v478_v42 = vld [vmem:[#allocation5 + $0x320] sm:$0xff] }
  0x7f   : > { %797 = vmatpush.msrb.mxu0 %v442_v44  ;;  %849 = vmatpush.msra.mxu1 %v471_v45  ;;  %v494_v43 = vld [vmem:[#allocation5 + $0x3a0] sm:$0xff]  ;;  %v511_v44 = vld [vmem:[#allocation5 + $0x428] sm:$0xff] }
  0x80   : > { %736 = vmatmul.f32.gmra.mxu3 %v246_v46  ;;  %798 = vmatmul.f32.vlgmr.msrb.gmra.mxu0 %v238_v47  ;;  %v462_v45 = vld [vmem:[#allocation5 + $0x2a0] sm:$0xff]  ;;  %v308_v46 = vld [vmem:[%s1813_s5 + $0x250] sm:$0xff]  ;;  %v307_v47 = vld [vmem:[%s1813_s5 + $0x248] sm:$0xff] }
  0x81   : > { %1042 = vmatpush.msra.mxu0 %v521_v48  ;;  %915 = vmatpush.msra.mxu2 %v486_v49  ;;  %v309_v48 = vld [vmem:[%s1813_s5 + $0x258] sm:$0xff] }
  0x82   : > { %980 = vmatpush.msra.mxu3 %v502_v50  ;;  %850 = vmatpush.msra.mxu1 %v470_v51  ;;  %v301_v49 = vld [vmem:[%s1813_s5 + $0x218] sm:$0xff] }
  0x83   : > { %1043 = vmatpush.msra.mxu0 %v520_v52  ;;  %916 = vmatpush.msra.mxu2 %v485_v53  ;;  %v477_v50 = vld [vmem:[#allocation5 + $0x318] sm:$0xff]  ;;  %v510_v52 = vld [vmem:[#allocation5 + $0x420] sm:$0xff] }
  0x84   : > { %981 = vmatpush.msra.mxu3 %v501_v54  ;;  %851 = vmatpush.msra.mxu1 %v469_v55  ;;  %v493_v51 = vld [vmem:[#allocation5 + $0x398] sm:$0xff]  ;;  %v316_v55 = vld [vmem:[%s1813_s5 + $0x290] sm:$0xff] }
  0x85   : > { %674 = vmatmul.f32.gmra.mxu2 %v254_v56  ;;  %1044 = vmatpush.msra.mxu0 %v519_v57  ;;  %v461_v53 = vld [vmem:[#allocation5 + $0x298] sm:$0xff]  ;;  %v318_v56 = vld [vmem:[%s1813_s5 + $0x2a0] sm:$0xff] }
  0x86   : > { %609 = vmatmul.f32.gmra.mxu1 %v253_v58  ;;  %917 = vmatpush.msra.mxu2 %v484_v59  ;;  %v317_v54 = vld [vmem:[%s1813_s5 + $0x298] sm:$0xff]  ;;  %v310_v57 = vld [vmem:[%s1813_s5 + $0x260] sm:$0xff]  ;;  %v476_v58 = vld [vmem:[#allocation5 + $0x310] sm:$0xff] }
  0x87   : > { %1045 = vmatpush.msra.mxu0 %v518_v60  ;;  %982 = vmatpush.msra.mxu3 %v500_v61  ;;  %v492_v59 = vld [vmem:[#allocation5 + $0x390] sm:$0xff]  ;;  %v509_v60 = vld [vmem:[#allocation5 + $0x418] sm:$0xff] }
  0x88   : > { %739 = vmatmul.f32.gmra.mxu3 %v255_v62  ;;  %801 = vmatmul.f32.gmra.mxu0 %v247_v63  ;;  %v460_v61 = vld [vmem:[#allocation5 + $0x290] sm:$0xff]  ;;  %v326_v62 = vld [vmem:[%s1813_s5 + $0x2e0] sm:$0xff]  ;;  %v325_v63 = vld [vmem:[%s1813_s5 + $0x2d8] sm:$0xff] }
  0x89   : > { %1046 = vmatpush.msra.mxu0 %v517_v0  ;;  %852 = vmatpush.msra.mxu1 %v468_v1  ;;  %v327_v0 = vld [vmem:[%s1813_s5 + $0x2e8] sm:$0xff] }
  0x8a   : > { %918 = vmatpush.msra.mxu2 %v483_v2  ;;  %983 = vmatpush.msra.mxu3 %v499_v3  ;;  %v319_v1 = vld [vmem:[%s1813_s5 + $0x2a8] sm:$0xff] }
  0x8b   : > { %1047 = vmatpush.msra.mxu0 %v516_v4  ;;  %853 = vmatpush.msra.mxu1 %v467_v5  ;;  %v475_v2 = vld [vmem:[#allocation5 + $0x308] sm:$0xff]  ;;  %v508_v4 = vld [vmem:[#allocation5 + $0x410] sm:$0xff] }
  0x8c   : > { %919 = vmatpush.msra.mxu2 %v482_v10  ;;  %984 = vmatpush.msra.mxu3 %v498_v11  ;;  %v491_v3 = vld [vmem:[#allocation5 + $0x388] sm:$0xff]  ;;  %v474_v11 = vld [vmem:[#allocation5 + $0x300] sm:$0xff] }
  0x8d   : > { %677 = vmatmul.f32.gmra.mxu2 %v263_v6  ;;  %1048 = vmatpush.msra.mxu0 %v515_v12  ;;  %v459_v5 = vld [vmem:[#allocation5 + $0x288] sm:$0xff]  ;;  %v490_v12 = vld [vmem:[#allocation5 + $0x380] sm:$0xff] }
  0x8e   : > { %612 = vmatmul.f32.gmra.mxu1 %v262_v7  ;;  %920 = vmatpush.msra.mxu2 %v481_v18  ;;  %v335_v6 = vld [vmem:[%s1813_s5 + $0x328] sm:$0xff]  ;;  %v334_v7 = vld [vmem:[%s1813_s5 + $0x320] sm:$0xff]  ;;  %v345_v18 = vld [vmem:[%s1813_s5 + $0x378] sm:$0xff] }
  0x8f   : > { %854 = vmatpush.msra.mxu1 %v466_v13  ;;  %985 = vmatpush.msra.mxu3 %v497_v19  ;;  %v507_v13 = vld [vmem:[#allocation5 + $0x408] sm:$0xff]  ;;  %v337_v19 = vld [vmem:[%s1813_s5 + $0x338] sm:$0xff] }
  0x90   : > { %742 = vmatmul.f32.gmra.mxu3 %v264_v8  ;;  %804 = vmatmul.f32.gmra.mxu0 %v256_v9  ;;  %v336_v8 = vld [vmem:[%s1813_s5 + $0x330] sm:$0xff] }
  0x91   : > { %1049 = vmatpush.msra.mxu0 %v514_v20  ;;  %855 = vmatpush.msra.mxu1 %v465_v21  ;;  %v328_v9 = vld [vmem:[%s1813_s5 + $0x2f0] sm:$0xff] }
  0x92   : > { %921 = vmatpush.msra.mxu2 %v480_v26  ;;  %986 = vmatpush.msra.mxu3 %v496_v27  ;;  %v354_v27 = vld [vmem:[%s1813_s5 + $0x3c0] sm:$0xff] }
  0x93   : > { %1050 = vmatpush.msra.mxu0 %v513_v28  ;;  %856 = vmatpush.msra.mxu1 %v464_v29  ;;  %v346_v28 = vld [vmem:[%s1813_s5 + $0x380] sm:$0xff] }
  0x94   : > { %922 = vmatpush.msra.mxu2 %v479_v34  ;;  %987 = vmatpush.msra.mxu3 %v495_v35  ;;  %v363_v35 = vld [vmem:[%s1813_s5 + $0x408] sm:$0xff] }
  0x95   : > { %680 = vmatmul.f32.gmra.mxu2 %v272_v14  ;;  %1051 = vmatpush.msra.mxu0 %v512_v36  ;;  %v458_v14 = vld [vmem:[#allocation5 + $0x280] sm:$0xff]  ;;  %v355_v36 = vld [vmem:[%s1813_s5 + $0x3c8] sm:$0xff] }
  0x96   : > { %615 = vmatmul.f32.gmra.mxu1 %v271_v15  ;;  %923 = vmatpush.msra.mxu2 %v478_v42  ;;  %v344_v15 = vld [vmem:[%s1813_s5 + $0x370] sm:$0xff] }
  0x97   : > { %857 = vmatpush.msra.mxu1 %v463_v37  ;;  %988 = vmatpush.msra.mxu3 %v494_v43  ;;  %v372_v42 = vld [vmem:[%s1813_s5 + $0x450] sm:$0xff] }
  0x98   : > { %745 = vmatmul.f32.gmra.mxu3 %v273_v16  ;;  %807 = vmatmul.f32.gmra.mxu0 %v265_v17  ;;  %v343_v16 = vld [vmem:[%s1813_s5 + $0x368] sm:$0xff]  ;;  %v364_v43 = vld [vmem:[%s1813_s5 + $0x410] sm:$0xff] }
  0x99   : > { %1052 = vmatpush.msra.mxu0 %v511_v44  ;;  %858 = vmatpush.msra.mxu1 %v462_v45 }
  0x9a   : > { %924 = vmatpush.msra.mxu2 %v477_v50  ;;  %989 = vmatpush.msra.mxu3 %v493_v51  ;;  %v373_v50 = vld [vmem:[%s1813_s5 + $0x458] sm:$0xff] }
  0x9b   : > { %1053 = vmatpush.msra.mxu0 %v510_v52  ;;  %859 = vmatpush.msra.mxu1 %v461_v53  ;;  %v241_v51 = vld [vmem:[%s1813_s5 + $0x38] sm:$0xff] }
  0x9c   : > { %925 = vmatpush.msra.mxu2 %v476_v58  ;;  %990 = vmatpush.msra.mxu3 %v492_v59  ;;  %v248_v58 = vld [vmem:[%s1813_s5 + $0x70] sm:$0xff] }
  0x9d   : > { %683 = vmatmul.f32.gmra.mxu2 %v281_v22  ;;  %1054 = vmatpush.msra.mxu0 %v509_v60 }
  0x9e   : > { %618 = vmatmul.f32.gmra.mxu1 %v280_v23  ;;  %926 = vmatpush.msra.mxu2 %v475_v2  ;;  %v506_v23 = vld [vmem:[#allocation5 + $0x400] sm:$0xff] }
  0x9f   : > { %860 = vmatpush.msra.mxu1 %v460_v61  ;;  %991 = vmatpush.msra.mxu3 %v491_v3  ;;  %v250_v61 = vld [vmem:[%s1813_s5 + $0x80] sm:$0xff] }
  0xa0   : > { %748 = vmatmul.f32.gmra.mxu3 %v282_v24  ;;  %810 = vmatmul.f32.gmra.mxu0 %v274_v25  ;;  %v353_v24 = vld [vmem:[%s1813_s5 + $0x3b8] sm:$0xff]  ;;  %v352_v25 = vld [vmem:[%s1813_s5 + $0x3b0] sm:$0xff]  ;;  %v258_v2 = vld [vmem:[%s1813_s5 + $0xc0] sm:$0xff] }
  0xa1   : > { %1055 = vmatpush.msra.mxu0 %v508_v4  ;;  %861 = vmatpush.msra.mxu1 %v459_v5  ;;  %v257_v5 = vld [vmem:[%s1813_s5 + $0xb8] sm:$0xff] }
  0xa2   : > { %927 = vmatpush.msra.mxu2 %v474_v11  ;;  %992 = vmatpush.msra.mxu3 %v490_v12 }
  0xa3   : > { %1056 = vmatpush.msra.mxu0 %v507_v13  ;;  %862 = vmatpush.msra.mxu1 %v458_v14  ;;  %v267_v14 = vld [vmem:[%s1813_s5 + $0x108] sm:$0xff] }
  0xa5   : > { %686 = vmatmul.f32.gmra.mxu2 %v290_v30  ;;  %1057 = vmatpush.msra.mxu0 %v506_v23  ;;  %v268_v23 = vld [vmem:[%s1813_s5 + $0x110] sm:$0xff] }
  0xa6   : > { %621 = vmatmul.f32.gmra.mxu1 %v289_v31 }
  0xa8   : > { %751 = vmatmul.f32.gmra.mxu3 %v291_v32  ;;  %813 = vmatmul.f32.gmra.mxu0 %v283_v33  ;;  %v362_v32 = vld [vmem:[%s1813_s5 + $0x400] sm:$0xff]  ;;  %v361_v33 = vld [vmem:[%s1813_s5 + $0x3f8] sm:$0xff] }
  0xad   : > { %689 = vmatmul.f32.gmra.mxu2 %v299_v38 }
  0xae   : > { %624 = vmatmul.f32.gmra.mxu1 %v298_v39  ;;  %v371_v39 = vld [vmem:[%s1813_s5 + $0x448] sm:$0xff] }
  0xb0   : > { %754 = vmatmul.f32.gmra.mxu3 %v300_v40  ;;  %816 = vmatmul.f32.gmra.mxu0 %v292_v41  ;;  %v370_v41 = vld [vmem:[%s1813_s5 + $0x440] sm:$0xff] }
  0xb5   : > { %692 = vmatmul.f32.gmra.mxu2 %v308_v46  ;;  %v240_v46 = vld [vmem:[%s1813_s5 + $0x30] sm:$0xff] }
  0xb6   : > { %627 = vmatmul.f32.gmra.mxu1 %v307_v47 }
  0xb8   : > { %757 = vmatmul.f32.gmra.mxu3 %v309_v48  ;;  %819 = vmatmul.f32.gmra.mxu0 %v301_v49  ;;  %v239_v48 = vld [vmem:[%s1813_s5 + $0x28] sm:$0xff] }
  0xbd   : > { %695 = vmatmul.f32.gmra.mxu2 %v317_v54 }
  0xbe   : > { %630 = vmatmul.f32.gmra.mxu1 %v316_v55  ;;  %v249_v55 = vld [vmem:[%s1813_s5 + $0x78] sm:$0xff] }
  0xc0   : > { %760 = vmatmul.f32.gmra.mxu3 %v318_v56  ;;  %822 = vmatmul.f32.gmra.mxu0 %v310_v57 }
  0xc5   : > { %698 = vmatmul.f32.gmra.mxu2 %v326_v62  ;;  %v242_v62 = vld [vmem:[%s1813_s5 + $0x40] sm:$0xff] }
  0xc6   : > { %633 = vmatmul.f32.gmra.mxu1 %v325_v63 }
  0xc8   : > { %763 = vmatmul.f32.gmra.mxu3 %v327_v0  ;;  %825 = vmatmul.f32.gmra.mxu0 %v319_v1 }
  0xcd   : > { %701 = vmatmul.f32.gmra.mxu2 %v335_v6  ;;  %v1886_v10 = vpop.f32.mrf.mxu1 }
  0xce   : > { %636 = vmatmul.f32.gmra.mxu1 %v334_v7 }
  0xd0   : > { %766 = vmatmul.f32.gmra.mxu3 %v336_v8  ;;  %828 = vmatmul.f32.gmra.mxu0 %v328_v9  ;;  %v259_v8 = vld [vmem:[%s1813_s5 + $0xc8] sm:$0xff] }
  0xd1   : > { %v251_v9 = vld [vmem:[%s1813_s5 + $0x88] sm:$0xff] }
  0xd3   : > { %v1890_v17 = vpop.f32.mrf.mxu2  ;;  %v539_v22 = vpop.f32.mrf.mxu0 }
  0xd5   : > { %704 = vmatmul.f32.gmra.mxu2 %v344_v15  ;;  %v1894_v20 = vpop.f32.mrf.mxu3 }
  0xd6   : > { %639 = vmatmul.f32.gmra.mxu1 %v343_v16  ;;  %v1896_v21 = vpop.f32.mrf.mxu1 }
  0xd8   : > { %769 = vmatmul.f32.gmra.mxu3 %v345_v18  ;;  %831 = vmatmul.f32.gmra.mxu0 %v337_v19  ;;  %v266_v18 = vld [vmem:[%s1813_s5 + $0x100] sm:$0xff] }
  0xdb   : > { %v1900_v26 = vpop.f32.mrf.mxu2 }
  0xdd   : > { %707 = vmatmul.f32.gmra.mxu2 %v353_v24  ;;  %v260_v24 = vld [vmem:[%s1813_s5 + $0xd0] sm:$0xff] }
  0xde   : > { %642 = vmatmul.f32.gmra.mxu1 %v352_v25  ;;  %v1904_v29 = vpop.f32.mrf.mxu3 }
  0xdf   : > { %v1906_v30 = vpop.f32.mrf.mxu1 }
  0xe0   : > { %772 = vmatmul.f32.gmra.mxu3 %v354_v27  ;;  %834 = vmatmul.f32.gmra.mxu0 %v346_v28 }
  0xe1   : > { %v542_v31 = vpop.f32.mrf.mxu0 }
  0xe4   : > { %v1910_v34 = vpop.f32.mrf.mxu2 }
  0xe5   : > { %710 = vmatmul.f32.gmra.mxu2 %v362_v32 }
  0xe6   : > { %645 = vmatmul.f32.gmra.mxu1 %v361_v33 }
  0xe8   : > { %775 = vmatmul.f32.gmra.mxu3 %v363_v35  ;;  %837 = vmatmul.f32.gmra.mxu0 %v355_v36  ;;  %v1914_v37 = vpop.f32.mrf.mxu3  ;;  %v275_v35 = vld [vmem:[%s1813_s5 + $0x148] sm:$0xff] }
  0xe9   : > { %v1916_v38 = vpop.f32.mrf.mxu1 }
  0xeb   : > { %v545_v40 = vpop.f32.mrf.mxu0 }
  0xed   : > { %713 = vmatmul.f32.gmra.mxu2 %v371_v39 }
  0xee   : > { %648 = vmatmul.f32.gmra.mxu1 %v370_v41  ;;  %v1922_v44 = vpop.f32.mrf.mxu2  ;;  %v269_v41 = vld [vmem:[%s1813_s5 + $0x118] sm:$0xff] }
  0xf0   : > { %778 = vmatmul.f32.gmra.mxu3 %v372_v42  ;;  %840 = vmatmul.f32.gmra.mxu0 %v364_v43 }
  0xf2   : > { %v1924_v45 = vpop.f32.mrf.mxu3 }
  0xf3   : > { %v604_v47 = vpop.f32.mrf.mxu1 }
  0xf4   : > { %v605_v52 = vadd.f32 %v604_v47, %v539_v22  ;;  %v285_v47 = vld [vmem:[%s1813_s5 + $0x198] sm:$0xff] }
  0xf5   : > { %v548_v49 = vpop.f32.mrf.mxu0  ;;  %928 = vmatmul.f32.vlgmr.msra.gmra.mxu2 %v240_v46 }
  0xf6   : > { %863 = vmatmul.f32.vlgmr.msra.gmra.mxu1 %v239_v48 }
  0xf8   : > { %843 = vmatmul.f32.gmra.mxu0 %v373_v50  ;;  %993 = vmatmul.f32.vlgmr.msra.gmra.mxu3 %v241_v51  ;;  %v669_v53 = vpop.f32.mrf.mxu2  ;;  %v284_v50 = vld [vmem:[%s1813_s5 + $0x190] sm:$0xff] }
  0xf9   : > { %v670_v54 = vadd.f32 %v669_v53, %v605_v52  ;;  %v286_v53 = vld [vmem:[%s1813_s5 + $0x1a0] sm:$0xff] }
  0xfb   : > { %v607_v56 = vpop.f32.mrf.mxu1  ;;  %v734_v57 = vpop.f32.mrf.mxu3 }
  0xfc   : > { %v1932_v59 = vadd.f32 %v734_v57, %v670_v54  ;;  %v608_v63 = vadd.f32 %v607_v56, %v542_v31  ;;  %v276_v31 = vld [vmem:[%s1813_s5 + $0x150] sm:$0xff]  ;;  %v278_v54 = vld [vmem:[%s1813_s5 + $0x160] sm:$0xff] }
  0xfd   : > { %v1934_v60 = vpop.f32.mrf.mxu0  ;;  %931 = vmatmul.f32.gmra.mxu2 %v249_v55  ;;  %v294_v57 = vld [vmem:[%s1813_s5 + $0x1e0] sm:$0xff] }
  0xfe   : > { %866 = vmatmul.f32.gmra.mxu1 %v248_v58 }
 0x100   : > { %996 = vmatmul.f32.gmra.mxu3 %v250_v61  ;;  %1058 = vmatmul.f32.vlgmr.msra.gmra.mxu0 %v242_v62  ;;  %v672_v0 = vpop.f32.mrf.mxu2  ;;  %v293_v62 = vld [vmem:[%s1813_s5 + $0x1d8] sm:$0xff] }
 0x101   : > { %v673_v1 = vadd.f32 %v672_v0, %v608_v63 }
 0x103   : > { %v610_v3 = vpop.f32.mrf.mxu1  ;;  %v737_v4 = vpop.f32.mrf.mxu3 }
 0x104   : > { %v1940_v6 = vadd.f32 %v737_v4, %v673_v1  ;;  %v611_v11 = vadd.f32 %v610_v3, %v545_v40  ;;  %v277_v40 = vld [vmem:[%s1813_s5 + $0x158] sm:$0xff]  ;;  %v295_v1 = vld [vmem:[%s1813_s5 + $0x1e8] sm:$0xff] }
 0x105   : > { %v1942_v7 = vpop.f32.mrf.mxu0  ;;  %934 = vmatmul.f32.gmra.mxu2 %v258_v2  ;;  %v287_v2 = vld [vmem:[%s1813_s5 + $0x1a8] sm:$0xff] }
 0x106   : > { %869 = vmatmul.f32.gmra.mxu1 %v257_v5  ;;  %v303_v5 = vld [vmem:[%s1813_s5 + $0x228] sm:$0xff] }
 0x108   : > { %999 = vmatmul.f32.gmra.mxu3 %v259_v8  ;;  %1061 = vmatmul.f32.gmra.mxu0 %v251_v9  ;;  %v675_v12 = vpop.f32.mrf.mxu2 }
 0x109   : > { %v676_v13 = vadd.f32 %v675_v12, %v611_v11  ;;  %v302_v11 = vld [vmem:[%s1813_s5 + $0x220] sm:$0xff] }
 0x10b   : > { %v613_v15 = vpop.f32.mrf.mxu1  ;;  %v740_v16 = vpop.f32.mrf.mxu3 }
 0x10c   : > { %v1948_v19 = vadd.f32 %v740_v16, %v676_v13  ;;  %v614_v25 = vadd.f32 %v613_v15, %v548_v49  ;;  %v296_v15 = vld [vmem:[%s1813_s5 + $0x1f0] sm:$0xff] }
 0x10d   : > { %v1950_v22 = vpop.f32.mrf.mxu0  ;;  %937 = vmatmul.f32.gmra.mxu2 %v267_v14  ;;  %v304_v14 = vld [vmem:[%s1813_s5 + $0x230] sm:$0xff] }
 0x10e   : > { %872 = vmatmul.f32.gmra.mxu1 %v266_v18 }
 0x110   : > { %1002 = vmatmul.f32.gmra.mxu3 %v268_v23  ;;  %1064 = vmatmul.f32.gmra.mxu0 %v260_v24  ;;  %v678_v27 = vpop.f32.mrf.mxu2  ;;  %v312_v23 = vld [vmem:[%s1813_s5 + $0x270] sm:$0xff] }
 0x111   : > { %v679_v28 = vadd.f32 %v678_v27, %v614_v25  ;;  %v311_v27 = vld [vmem:[%s1813_s5 + $0x268] sm:$0xff] }
 0x113   : > { %v616_v32 = vpop.f32.mrf.mxu1  ;;  %v743_v33 = vpop.f32.mrf.mxu3 }
 0x114   : > { %v1956_v36 = vadd.f32 %v743_v33, %v679_v28  ;;  %v617_v42 = vadd.f32 %v616_v32, %v1886_v10  ;;  %v313_v32 = vld [vmem:[%s1813_s5 + $0x278] sm:$0xff] }
 0x115   : > { %v1958_v39 = vpop.f32.mrf.mxu0  ;;  %940 = vmatmul.f32.gmra.mxu2 %v276_v31  ;;  %v305_v33 = vld [vmem:[%s1813_s5 + $0x238] sm:$0xff] }
 0x116   : > { %875 = vmatmul.f32.gmra.mxu1 %v275_v35 }
 0x118   : > { %1005 = vmatmul.f32.gmra.mxu3 %v277_v40  ;;  %1067 = vmatmul.f32.gmra.mxu0 %v269_v41  ;;  %v681_v43 = vpop.f32.mrf.mxu2  ;;  %v321_v41 = vld [vmem:[%s1813_s5 + $0x2b8] sm:$0xff] }
 0x119   : > { %v682_v46 = vadd.f32 %v681_v43, %v617_v42 }
 0x11b   : > { %v619_v48 = vpop.f32.mrf.mxu1  ;;  %v746_v49 = vpop.f32.mrf.mxu3 }
 0x11c   : > { %v1965_v51 = vadd.f32 %v746_v49, %v682_v46  ;;  %v620_v10 = vadd.f32 %v619_v48, %v1896_v21  ;;  %v320_v46 = vld [vmem:[%s1813_s5 + $0x2b0] sm:$0xff]  ;;  %v322_v49 = vld [vmem:[%s1813_s5 + $0x2c0] sm:$0xff] }
 0x11d   : > { %v1967_v52 = vpop.f32.mrf.mxu0  ;;  %943 = vmatmul.f32.gmra.mxu2 %v285_v47 }
 0x11e   : > { %878 = vmatmul.f32.gmra.mxu1 %v284_v50  ;;  %v314_v50 = vld [vmem:[%s1813_s5 + $0x280] sm:$0xff] }
 0x120   : > { %1008 = vmatmul.f32.gmra.mxu3 %v286_v53  ;;  %1070 = vmatmul.f32.gmra.mxu0 %v278_v54  ;;  %v684_v55 = vpop.f32.mrf.mxu2 }
 0x121   : > { %v685_v56 = vadd.f32 %v684_v55, %v620_v10  ;;  %v330_v55 = vld [vmem:[%s1813_s5 + $0x300] sm:$0xff] }
 0x123   : > { %v622_v58 = vpop.f32.mrf.mxu1  ;;  %v749_v61 = vpop.f32.mrf.mxu3 }
 0x124   : > { %v1974_v63 = vadd.f32 %v749_v61, %v685_v56  ;;  %v623_v21 = vadd.f32 %v622_v58, %v1906_v30  ;;  %v329_v58 = vld [vmem:[%s1813_s5 + $0x2f8] sm:$0xff] }
 0x125   : > { %v1976_v0 = vpop.f32.mrf.mxu0  ;;  %946 = vmatmul.f32.gmra.mxu2 %v294_v57 }
 0x126   : > { %881 = vmatmul.f32.gmra.mxu1 %v293_v62 }
 0x128   : > { %1011 = vmatmul.f32.gmra.mxu3 %v295_v1  ;;  %1073 = vmatmul.f32.gmra.mxu0 %v287_v2  ;;  %v687_v3 = vpop.f32.mrf.mxu2  ;;  %v331_v1 = vld [vmem:[%s1813_s5 + $0x308] sm:$0xff] }
 0x129   : > { %v688_v4 = vadd.f32 %v687_v3, %v623_v21  ;;  %v323_v2 = vld [vmem:[%s1813_s5 + $0x2c8] sm:$0xff] }
 0x12b   : > { %v625_v8 = vpop.f32.mrf.mxu1  ;;  %v752_v9 = vpop.f32.mrf.mxu3 }
 0x12c   : > { %v1983_v12 = vadd.f32 %v752_v9, %v688_v4  ;;  %v626_v30 = vadd.f32 %v625_v8, %v1916_v38 }
 0x12d   : > { %v1985_v13 = vpop.f32.mrf.mxu0  ;;  %949 = vmatmul.f32.gmra.mxu2 %v303_v5  ;;  %v339_v5 = vld [vmem:[%s1813_s5 + $0x348] sm:$0xff] }
 0x12e   : > { %884 = vmatmul.f32.gmra.mxu1 %v302_v11  ;;  %v338_v11 = vld [vmem:[%s1813_s5 + $0x340] sm:$0xff] }
 0x130   : > { %1014 = vmatmul.f32.gmra.mxu3 %v304_v14  ;;  %1076 = vmatmul.f32.gmra.mxu0 %v296_v15  ;;  %v690_v16 = vpop.f32.mrf.mxu2 }
 0x131   : > { %v691_v18 = vadd.f32 %v690_v16, %v626_v30  ;;  %v340_v30 = vld [vmem:[%s1813_s5 + $0x350] sm:$0xff] }
 0x132   : > { %v332_v16 = vld [vmem:[%s1813_s5 + $0x310] sm:$0xff] }
 0x133   : > { %v628_v24 = vpop.f32.mrf.mxu1  ;;  %v755_v25 = vpop.f32.mrf.mxu3 }
 0x134   : > { %v1992_v28 = vadd.f32 %v755_v25, %v691_v18  ;;  %v629_v38 = vadd.f32 %v628_v24, %v1890_v17  ;;  %v348_v25 = vld [vmem:[%s1813_s5 + $0x390] sm:$0xff] }
 0x135   : > { %v1994_v31 = vpop.f32.mrf.mxu0  ;;  %952 = vmatmul.f32.gmra.mxu2 %v312_v23 }
 0x136   : > { %887 = vmatmul.f32.gmra.mxu1 %v311_v27 }
 0x138   : > { %1017 = vmatmul.f32.gmra.mxu3 %v313_v32  ;;  %1079 = vmatmul.f32.gmra.mxu0 %v305_v33  ;;  %v693_v35 = vpop.f32.mrf.mxu2  ;;  %v347_v33 = vld [vmem:[%s1813_s5 + $0x388] sm:$0xff] }
 0x139   : > { %v694_v40 = vadd.f32 %v693_v35, %v629_v38 }
 0x13b   : > { %v631_v42 = vpop.f32.mrf.mxu1  ;;  %v758_v43 = vpop.f32.mrf.mxu3 }
 0x13c   : > { %v759_v47 = vadd.f32 %v758_v43, %v694_v40  ;;  %v632_v17 = vadd.f32 %v631_v42, %v1900_v26  ;;  %v349_v40 = vld [vmem:[%s1813_s5 + $0x398] sm:$0xff] }
 0x13d   : > { %v823_v48 = vpop.f32.mrf.mxu0  ;;  %955 = vmatmul.f32.gmra.mxu2 %v321_v41  ;;  %v341_v41 = vld [vmem:[%s1813_s5 + $0x358] sm:$0xff] }
 0x13e   : > { %v2003_v53 = vadd.f32 %v823_v48, %v759_v47  ;;  %890 = vmatmul.f32.gmra.mxu1 %v320_v46  ;;  %v357_v47 = vld [vmem:[%s1813_s5 + $0x3d8] sm:$0xff] }
 0x140   : > { %1020 = vmatmul.f32.gmra.mxu3 %v322_v49  ;;  %1082 = vmatmul.f32.gmra.mxu0 %v314_v50  ;;  %v696_v54 = vpop.f32.mrf.mxu2  ;;  %v356_v50 = vld [vmem:[%s1813_s5 + $0x3d0] sm:$0xff] }
 0x141   : > { %v697_v10 = vadd.f32 %v696_v54, %v632_v17 }
 0x143   : > { %v634_v56 = vpop.f32.mrf.mxu1  ;;  %v761_v57 = vpop.f32.mrf.mxu3 }
 0x144   : > { %v762_v61 = vadd.f32 %v761_v57, %v697_v10  ;;  %v635_v26 = vadd.f32 %v634_v56, %v1910_v34  ;;  %v358_v10 = vld [vmem:[%s1813_s5 + $0x3e0] sm:$0xff] }
 0x145   : > { %v826_v62 = vpop.f32.mrf.mxu0  ;;  %958 = vmatmul.f32.gmra.mxu2 %v330_v55  ;;  %v350_v55 = vld [vmem:[%s1813_s5 + $0x3a0] sm:$0xff] }
 0x146   : > { %v2010_v21 = vadd.f32 %v826_v62, %v762_v61  ;;  %893 = vmatmul.f32.gmra.mxu1 %v329_v58  ;;  %v366_v61 = vld [vmem:[%s1813_s5 + $0x420] sm:$0xff] }
 0x148   : > { %1023 = vmatmul.f32.gmra.mxu3 %v331_v1  ;;  %1085 = vmatmul.f32.gmra.mxu0 %v323_v2  ;;  %v699_v3 = vpop.f32.mrf.mxu2  ;;  %v365_v2 = vld [vmem:[%s1813_s5 + $0x418] sm:$0xff] }
 0x149   : > { %v700_v4 = vadd.f32 %v699_v3, %v635_v26 }
 0x14b   : > { %v637_v8 = vpop.f32.mrf.mxu1  ;;  %v764_v9 = vpop.f32.mrf.mxu3 }
 0x14c   : > { %v765_v14 = vadd.f32 %v764_v9, %v700_v4  ;;  %v638_v34 = vadd.f32 %v637_v8, %v1922_v44  ;;  %v367_v4 = vld [vmem:[%s1813_s5 + $0x428] sm:$0xff] }
 0x14d   : > { %v829_v15 = vpop.f32.mrf.mxu0  ;;  %961 = vmatmul.f32.gmra.mxu2 %v339_v5  ;;  %v359_v5 = vld [vmem:[%s1813_s5 + $0x3e8] sm:$0xff] }
 0x14e   : > { %v2017_v18 = vadd.f32 %v829_v15, %v765_v14  ;;  %896 = vmatmul.f32.gmra.mxu1 %v338_v11  ;;  %v375_v14 = vld [vmem:[%s1813_s5 + $0x468] sm:$0xff] }
 0x150   : > { %1026 = vmatmul.f32.gmra.mxu3 %v340_v30  ;;  %1088 = vmatmul.f32.gmra.mxu0 %v332_v16  ;;  %v702_v23 = vpop.f32.mrf.mxu2  ;;  %v374_v16 = vld [vmem:[%s1813_s5 + $0x460] sm:$0xff] }
 0x151   : > { %v703_v24 = vadd.f32 %v702_v23, %v638_v34 }
 0x153   : > { %v640_v27 = vpop.f32.mrf.mxu1  ;;  %v767_v32 = vpop.f32.mrf.mxu3 }
 0x154   : > { %v768_v38 = vadd.f32 %v767_v32, %v703_v24  ;;  %v641_v44 = vadd.f32 %v640_v27, %v1894_v20  ;;  %v376_v24 = vld [vmem:[%s1813_s5 + $0x470] sm:$0xff] }
 0x155   : > { %v832_v35 = vpop.f32.mrf.mxu0  ;;  %964 = vmatmul.f32.gmra.mxu2 %v348_v25  ;;  %v368_v25 = vld [vmem:[%s1813_s5 + $0x430] sm:$0xff] }
 0x156   : > { %v2024_v42 = vadd.f32 %v832_v35, %v768_v38  ;;  %899 = vmatmul.f32.gmra.mxu1 %v347_v33 }
 0x158   : > { %1029 = vmatmul.f32.gmra.mxu3 %v349_v40  ;;  %1091 = vmatmul.f32.gmra.mxu0 %v341_v41  ;;  %v705_v43 = vpop.f32.mrf.mxu2  ;;  %v800_v41 = vadd.f32 %v1934_v60, %v1932_v59 }
 0x159   : > { %v706_v46 = vadd.f32 %v705_v43, %v641_v44  ;;  %v377_v43 = vld [vmem:[%s1813_s5 + $0x478] sm:$0xff] }
 0x15b   : > { %v643_v48 = vpop.f32.mrf.mxu1  ;;  %v770_v49 = vpop.f32.mrf.mxu3 }
 0x15c   : > { %v771_v17 = vadd.f32 %v770_v49, %v706_v46  ;;  %v644_v20 = vadd.f32 %v643_v48, %v1904_v29 }
 0x15d   : > { %v835_v54 = vpop.f32.mrf.mxu0  ;;  %967 = vmatmul.f32.gmra.mxu2 %v357_v47 }
 0x15e   : > { %v2031_v56 = vadd.f32 %v835_v54, %v771_v17  ;;  %902 = vmatmul.f32.gmra.mxu1 %v356_v50  ;;  %v803_v54 = vadd.f32 %v1942_v7, %v1940_v6 }
 0x160   : > { %1032 = vmatmul.f32.gmra.mxu3 %v358_v10  ;;  %1094 = vmatmul.f32.gmra.mxu0 %v350_v55  ;;  %v708_v57 = vpop.f32.mrf.mxu2 }
 0x161   : > { %v709_v58 = vadd.f32 %v708_v57, %v644_v20 }
 0x163   : > { %v646_v62 = vpop.f32.mrf.mxu1  ;;  %v773_v1 = vpop.f32.mrf.mxu3 }
 0x164   : > { %v774_v26 = vadd.f32 %v773_v1, %v709_v58  ;;  %v647_v29 = vadd.f32 %v646_v62, %v1914_v37  ;;  %v806_v62 = vadd.f32 %v1950_v22, %v1948_v19 }
 0x165   : > { %v838_v3 = vpop.f32.mrf.mxu0  ;;  %970 = vmatmul.f32.gmra.mxu2 %v366_v61 }
 0x166   : > { %v2038_v8 = vadd.f32 %v838_v3, %v774_v26  ;;  %905 = vmatmul.f32.gmra.mxu1 %v365_v2 }
 0x168   : > { %1035 = vmatmul.f32.gmra.mxu3 %v367_v4  ;;  %1097 = vmatmul.f32.gmra.mxu0 %v359_v5  ;;  %v711_v9 = vpop.f32.mrf.mxu2 }
 0x169   : > { %v712_v11 = vadd.f32 %v711_v9, %v647_v29  ;;  %v809_v29 = vadd.f32 %v1958_v39, %v1956_v36 }
 0x16b   : > { %v649_v15 = vpop.f32.mrf.mxu1  ;;  %v776_v30 = vpop.f32.mrf.mxu3 }
 0x16c   : > { %v777_v34 = vadd.f32 %v776_v30, %v712_v11  ;;  %v650_v32 = vadd.f32 %v649_v15, %v1924_v45 }
 0x16d   : > { %v841_v23 = vpop.f32.mrf.mxu0  ;;  %973 = vmatmul.f32.gmra.mxu2 %v375_v14 }
 0x16e   : > { %v2045_v27 = vadd.f32 %v841_v23, %v777_v34  ;;  %908 = vmatmul.f32.gmra.mxu1 %v374_v16  ;;  %v812_v34 = vadd.f32 %v1967_v52, %v1965_v51 }
 0x170   : > { %1038 = vmatmul.f32.gmra.mxu3 %v376_v24  ;;  %1100 = vmatmul.f32.gmra.mxu0 %v368_v25  ;;  %v714_v37 = vpop.f32.mrf.mxu2 }
 0x171   : > { %v715_v33 = vadd.f32 %v714_v37, %v650_v32 }
 0x173   : > { %v779_v38 = vpop.f32.mrf.mxu3  ;;  %v864_v35 = vpop.f32.mrf.mxu1 }
 0x174   : > { %v780_v40 = vadd.f32 %v779_v38, %v715_v33  ;;  %v865_v47 = vadd.f32 %v864_v35, %v800_v41  ;;  %v815_v38 = vadd.f32 %v1976_v0, %v1974_v63 }
 0x175   : > { %v844_v44 = vpop.f32.mrf.mxu0 }
 0x176   : > { %v2051_v46 = vadd.f32 %v844_v44, %v780_v40 }
 0x178   : > { %1103 = vmatmul.f32.gmra.mxu0 %v377_v43  ;;  %v929_v48 = vpop.f32.mrf.mxu2 }
 0x179   : > { %v930_v49 = vadd.f32 %v929_v48, %v865_v47  ;;  %v818_v48 = vadd.f32 %v1985_v13, %v1983_v12 }
 0x17b   : > { %v867_v45 = vpop.f32.mrf.mxu1  ;;  %v994_v50 = vpop.f32.mrf.mxu3 }
 0x17c   : > { %v995_v17 = vadd.f32 %v994_v50, %v930_v49  ;;  %v868_v20 = vadd.f32 %v867_v45, %v803_v54 }
 0x17d   : > { %v1059_v10 = vpop.f32.mrf.mxu0 }
 0x17e   : > { %v2056_v55 = vadd.f32 %v1059_v10, %v995_v17 }
 0x180   : > { %1107 = vst [vmem:[%s2058_s26] sm:$0xff] %v2056_v55  ;;  %v932_v59 = vpop.f32.mrf.mxu2 }
 0x181   : > { %v933_v60 = vadd.f32 %v932_v59, %v868_v20  ;;  %v821_v20 = vadd.f32 %v1994_v31, %v1992_v28 }
 0x183   : > { %v870_v57 = vpop.f32.mrf.mxu1  ;;  %v997_v58 = vpop.f32.mrf.mxu3 }
 0x184   : > { %v998_v61 = vadd.f32 %v997_v58, %v933_v60  ;;  %v871_v1 = vadd.f32 %v870_v57, %v806_v62 }
 0x185   : > { %v1062_v6 = vpop.f32.mrf.mxu0 }
 0x186   : > { %v2064_v7 = vadd.f32 %v1062_v6, %v998_v61 }
 0x188   : > { %1108 = vst [vmem:[%s2058_s26 + $0x8] sm:$0xff] %v2064_v7  ;;  %v935_v2 = vpop.f32.mrf.mxu2 }
 0x189   : > { %v936_v26 = vadd.f32 %v935_v2, %v871_v1 }
 0x18b   : > { %v873_v3 = vpop.f32.mrf.mxu1  ;;  %v1000_v4 = vpop.f32.mrf.mxu3 }
 0x18c   : > { %v1001_v5 = vadd.f32 %v1000_v4, %v936_v26  ;;  %v874_v14 = vadd.f32 %v873_v3, %v809_v29 }
 0x18d   : > { %v1065_v9 = vpop.f32.mrf.mxu0 }
 0x18e   : > { %v2070_v11 = vadd.f32 %v1065_v9, %v1001_v5 }
 0x190   : > { %1109 = vst [vmem:[%s2058_s26 + $0x10] sm:$0xff] %v2070_v11  ;;  %v938_v19 = vpop.f32.mrf.mxu2 }
 0x191   : > { %v939_v22 = vadd.f32 %v938_v19, %v874_v14 }
 0x193   : > { %v876_v15 = vpop.f32.mrf.mxu1  ;;  %v1003_v30 = vpop.f32.mrf.mxu3 }
 0x194   : > { %v1004_v16 = vadd.f32 %v1003_v30, %v939_v22  ;;  %v877_v25 = vadd.f32 %v876_v15, %v812_v34 }
 0x195   : > { %v1068_v23 = vpop.f32.mrf.mxu0 }
 0x196   : > { %v2076_v24 = vadd.f32 %v1068_v23, %v1004_v16 }
 0x198   : > { %1110 = vst [vmem:[%s2058_s26 + $0x18] sm:$0xff] %v2076_v24  ;;  %v941_v36 = vpop.f32.mrf.mxu2 }
 0x199   : > { %v942_v39 = vadd.f32 %v941_v36, %v877_v25 }
 0x19b   : > { %v879_v32 = vpop.f32.mrf.mxu1  ;;  %v1006_v37 = vpop.f32.mrf.mxu3 }
 0x19c   : > { %v1007_v33 = vadd.f32 %v1006_v37, %v942_v39  ;;  %v880_v41 = vadd.f32 %v879_v32, %v815_v38 }
 0x19d   : > { %v1071_v35 = vpop.f32.mrf.mxu0 }
 0x19e   : > { %v2082_v40 = vadd.f32 %v1071_v35, %v1007_v33 }
 0x1a0   : > { %1111 = vst [vmem:[%s2058_s26 + $0x20] sm:$0xff] %v2082_v40  ;;  %v944_v51 = vpop.f32.mrf.mxu2 }
 0x1a1   : > { %v945_v52 = vadd.f32 %v944_v51, %v880_v41 }
 0x1a3   : > { %v882_v44 = vpop.f32.mrf.mxu1  ;;  %v1009_v43 = vpop.f32.mrf.mxu3 }
 0x1a4   : > { %v1010_v47 = vadd.f32 %v1009_v43, %v945_v52  ;;  %v883_v50 = vadd.f32 %v882_v44, %v818_v48 }
 0x1a5   : > { %v1074_v49 = vpop.f32.mrf.mxu0 }
 0x1a6   : > { %v2088_v45 = vadd.f32 %v1074_v49, %v1010_v47 }
 0x1a8   : > { %1112 = vst [vmem:[%s2058_s26 + $0x28] sm:$0xff] %v2088_v45  ;;  %v947_v63 = vpop.f32.mrf.mxu2 }
 0x1a9   : > { %v948_v0 = vadd.f32 %v947_v63, %v883_v50 }
 0x1ab   : > { %v885_v17 = vpop.f32.mrf.mxu1  ;;  %v1012_v54 = vpop.f32.mrf.mxu3 }
 0x1ac   : > { %v1013_v10 = vadd.f32 %v1012_v54, %v948_v0  ;;  %v886_v57 = vadd.f32 %v885_v17, %v821_v20 }
 0x1ad   : > { %v1077_v59 = vpop.f32.mrf.mxu0 }
 0x1ae   : > { %v2094_v60 = vadd.f32 %v1077_v59, %v1013_v10 }
 0x1b0   : > { %1113 = vst [vmem:[%s2058_s26 + $0x30] sm:$0xff] %v2094_v60  ;;  %v950_v12 = vpop.f32.mrf.mxu2 }
 0x1b1   : > { %v951_v13 = vadd.f32 %v950_v12, %v886_v57 }
 0x1b3   : > { %v888_v58 = vpop.f32.mrf.mxu1  ;;  %v1015_v61 = vpop.f32.mrf.mxu3 }
 0x1b4   : > { %v1016_v62 = vadd.f32 %v1015_v61, %v951_v13  ;;  %v889_v2 = vadd.f32 %v888_v58, %v2003_v53 }
 0x1b5   : > { %v1080_v6 = vpop.f32.mrf.mxu0 }
 0x1b6   : > { %v2098_v1 = vadd.f32 %v1080_v6, %v1016_v62 }
 0x1b8   : > { %1114 = vst [vmem:[%s2058_s26 + $0x38] sm:$0xff] %v2098_v1  ;;  %v953_v28 = vpop.f32.mrf.mxu2 }
 0x1b9   : > { %v954_v31 = vadd.f32 %v953_v28, %v889_v2 }
 0x1bb   : > { %v891_v26 = vpop.f32.mrf.mxu1  ;;  %v1018_v3 = vpop.f32.mrf.mxu3 }
 0x1bc   : > { %v1019_v4 = vadd.f32 %v1018_v3, %v954_v31  ;;  %v892_v9 = vadd.f32 %v891_v26, %v2010_v21 }
 0x1bd   : > { %v1083_v5 = vpop.f32.mrf.mxu0 }
 0x1be   : > { %v2103_v29 = vadd.f32 %v1083_v5, %v1019_v4 }
 0x1c0   : > { %1115 = vst [vmem:[%s2058_s26 + $0x40] sm:$0xff] %v2103_v29  ;;  %v956_v14 = vpop.f32.mrf.mxu2 }
 0x1c1   : > { %v957_v19 = vadd.f32 %v956_v14, %v892_v9 }
 0x1c3   : > { %v894_v22 = vpop.f32.mrf.mxu1  ;;  %v1021_v53 = vpop.f32.mrf.mxu3 }
 0x1c4   : > { %v1022_v15 = vadd.f32 %v1021_v53, %v957_v19  ;;  %v895_v34 = vadd.f32 %v894_v22, %v2017_v18 }
 0x1c5   : > { %v1086_v30 = vpop.f32.mrf.mxu0 }
 0x1c6   : > { %v2108_v16 = vadd.f32 %v1086_v30, %v1022_v15 }
 0x1c8   : > { %1116 = vst [vmem:[%s2058_s26 + $0x48] sm:$0xff] %v2108_v16  ;;  %v959_v23 = vpop.f32.mrf.mxu2 }
 0x1c9   : > { %v960_v25 = vadd.f32 %v959_v23, %v895_v34 }
 0x1cb   : > { %v897_v36 = vpop.f32.mrf.mxu1  ;;  %v1024_v21 = vpop.f32.mrf.mxu3 }
 0x1cc   : > { %v1025_v39 = vadd.f32 %v1024_v21, %v960_v25  ;;  %v898_v33 = vadd.f32 %v897_v36, %v2024_v42 }
 0x1cd   : > { %v1089_v32 = vpop.f32.mrf.mxu0 }
 0x1ce   : > { %v2113_v37 = vadd.f32 %v1089_v32, %v1025_v39 }
 0x1d0   : > { %1117 = vst [vmem:[%s2058_s26 + $0x50] sm:$0xff] %v2113_v37  ;;  %v962_v38 = vpop.f32.mrf.mxu2 }
 0x1d1   : > { %v963_v35 = vadd.f32 %v962_v38, %v898_v33 }
 0x1d3   : > { %v900_v41 = vpop.f32.mrf.mxu1  ;;  %v1027_v18 = vpop.f32.mrf.mxu3 }
 0x1d4   : > { %v1028_v51 = vadd.f32 %v1027_v18, %v963_v35  ;;  %v901_v43 = vadd.f32 %v900_v41, %v2031_v56 }
 0x1d5   : > { %v1092_v52 = vpop.f32.mrf.mxu0 }
 0x1d6   : > { %v2118_v44 = vadd.f32 %v1092_v52, %v1028_v51 }
 0x1d8   : > { %1118 = vst [vmem:[%s2058_s26 + $0x58] sm:$0xff] %v2118_v44  ;;  %v965_v47 = vpop.f32.mrf.mxu2 }
 0x1d9   : > { %v966_v48 = vadd.f32 %v965_v47, %v901_v43 }
 0x1db   : > { %v903_v49 = vpop.f32.mrf.mxu1  ;;  %v1030_v42 = vpop.f32.mrf.mxu3 }
 0x1dc   : > { %v1031_v50 = vadd.f32 %v1030_v42, %v966_v48  ;;  %v904_v17 = vadd.f32 %v903_v49, %v2038_v8 }
 0x1dd   : > { %v1095_v63 = vpop.f32.mrf.mxu0 }
 0x1de   : > { %v2123_v0 = vadd.f32 %v1095_v63, %v1031_v50 }
 0x1e0   : > { %1119 = vst [vmem:[%s2058_s26 + $0x60] sm:$0xff] %v2123_v0  ;;  %v968_v54 = vpop.f32.mrf.mxu2 }
 0x1e1   : > { %v969_v10 = vadd.f32 %v968_v54, %v904_v17 }
 0x1e3   : > { %v906_v20 = vpop.f32.mrf.mxu1  ;;  %v1033_v56 = vpop.f32.mrf.mxu3 }
 0x1e4   : > { %v1034_v59 = vadd.f32 %v1033_v56, %v969_v10  ;;  %v907_v13 = vadd.f32 %v906_v20, %v2045_v27 }
 0x1e5   : > { %v1098_v57 = vpop.f32.mrf.mxu0 }
 0x1e6   : > { %v2128_v12 = vadd.f32 %v1098_v57, %v1034_v59 }
 0x1e8   : > { %1120 = vst [vmem:[%s2058_s26 + $0x68] sm:$0xff] %v2128_v12  ;;  %v971_v58 = vpop.f32.mrf.mxu2 }
 0x1e9   : > { %v972_v61 = vadd.f32 %v971_v58, %v907_v13 }
 0x1eb   : > { %v1036_v62 = vpop.f32.mrf.mxu3  ;;  %v909_v8 = vpop.f32.mrf.mxu1 }
 0x1ec   : > { %v1037_v6 = vadd.f32 %v1036_v62, %v972_v61  ;;  %v910_v31 = vadd.f32 %v909_v8, %v2051_v46 }
 0x1ed   : > { %v1101_v2 = vpop.f32.mrf.mxu0 }
 0x1ee   : > { %v2133_v28 = vadd.f32 %v1101_v2, %v1037_v6 }
 0x1f0   : > { %1121 = vst [vmem:[%s2058_s26 + $0x70] sm:$0xff] %v2133_v28  ;;  %v974_v26 = vpop.f32.mrf.mxu2 }
 0x1f1   : > { %v975_v3 = vadd.f32 %v974_v26, %v910_v31 }
 0x1f3   : > { %v1039_v4 = vpop.f32.mrf.mxu3 }
 0x1f4   : > { %v1040_v5 = vadd.f32 %v1039_v4, %v975_v3  ;;  %1126 = sbr.rel (%p2250_p1) target bundleno = 508 (0x1fc), region = 40 }
 0x1f5   : > { %v1104_v27 = vpop.f32.mrf.mxu0 }
 0x1f6   : > { %v2138_v9 = vadd.f32 %v1104_v27, %v1040_v5 }
 0x1f8   : > { %1122 = vst [vmem:[%s2058_s26 + $0x78] sm:$0xff] %v2138_v9 }
 0x1f9   : > { %v1686_v14 = vmov 0.0  }
 0x1fa   : > { %1127 = vst [vmem:[#allocation8] sm:$0x1] %v1686_v14 }
 0x1fb   : > { %1128 = vst [vmem:[#allocation10] sm:$0x1] %v1686_v14 }
 0x1fc PF: > { %v1130_v46 = vadd.f32 %v2064_v7, %v2056_v55  ;;  %v1154_v19 = vmul.f32 %v2056_v55, %v2056_v55  ;;  %v1155_v22 = vmul.f32 %v2064_v7, %v2064_v7  ;;  %v1156_v15 = vmul.f32 %v2070_v11, %v2070_v11  ;;  %s1359_s23 = sshll.u32 %s1737_s19, 7  ;;  %s1206_s6 = sshll.u32 %s2058_s26, 4  ;;  %s1207_s6 = int_to_ptr.vmem [resolvable:$true] %s1206_s6 }
 0x1fd   : > { %v1157_v34 = vmul.f32 %v2076_v24, %v2076_v24  ;;  %s1205_s28 = scalar_lea.hbm %s2241_s2, %s1359_s23  ;;  %v1158_v7 = vmul.f32 %v2082_v40, %v2082_v40  ;;  %s1194_s11 = scalar_lea.sflag [#allocation4], %s1809_s20 }
 0x1fe   : > { %v1131_v53 = vadd.f32 %v1130_v46, %v2070_v11  ;;  %v1170_v23 = vadd.f32 %v1155_v22, %v1154_v19  ;;  %s1208_s7 = sshll.u32 %s1205_s28, 4  ;;  %s1569_s25 = scalar_lea.hbm %s2241_s2, 512  ;;  %s1209_s7 = int_to_ptr.hbm [resolvable:$true] %s1208_s7 }
 0x1ff   : > { %s1563_s13 = sshra.s32 %s1209_s7, 4  ;;  %s1564_s13 = int_to_ptr.hbm [resolvable:$true] %s1563_s13 }
 0x200   : > { %v1132_v30 = vadd.f32 %v1131_v53, %v2076_v24  ;;  %v1171_v11 = vadd.f32 %v1170_v23, %v1156_v15  ;;  %v1159_v24 = vmul.f32 %v2088_v45, %v2088_v45  ;;  %s1565_s14 = scalar_lea.hbm %s1564_s13, 128  ;;  %p1570_p9 = scmp.lt.s32.totalorder %s1564_s13, %s2241_s2 }
 0x201   : > { %p1566_p2 = scmp.ne.s32.totalorder %s1564_s13, %s1565_s14  ;;  %p1571_p10 = scmp.lt.s32.totalorder %s1569_s25, %s1565_s14 }
 0x202   : > { %v1133_v55 = vadd.f32 %v1132_v30, %v2082_v40  ;;  %v1172_v36 = vadd.f32 %v1171_v11, %v1157_v34 }
 0x203   : > { %p1567_p4 = pnand %p1566_p2, %p1783_p7  ;;  %p1572_p11 = por %p1571_p10, %p1570_p9 }
 0x204   : > { %v1134_v25 = vadd.f32 %v1133_v55, %v2088_v45 }
 0x205   : > { %p1568_p8 = pneg %p1567_p4 }
 0x207   : > { %p1573_p12 = pnand %p1572_p11, %p1568_p8 }
 0x209   : > { %1576 = shalt.err (!%p1573_p12)
}
 0x20a   : > { %s1687_s20 = smov 128   ;;  %s1688_s21 = smov 8   ;;  %v1135_v40 = vadd.f32 %v1134_v25, %v2094_v60  ;;  %v1160_v45 = vmul.f32 %v2094_v60, %v2094_v60  ;;  %v1173_v21 = vadd.f32 %v1172_v36, %v1158_v7  ;;  %v1161_v32 = vmul.f32 %v2098_v1, %v2098_v1  ;;  %v1129_v2 = vld [vmem:[#allocation8] sm:$0x1]  ;;  %v1153_v4 = vld [vmem:[#allocation10] sm:$0x1] }
 0x20b   : > { %1417 = dma.vmem_to_hbm [thread:$0]  (%p1783_p7), %s1207_s6, 2048, %s1209_s7, %s1194_s11, %s1687_s20, %s1687_s20, %s1688_s21   ;;  %v1162_v35 = vmul.f32 %v2103_v29, %v2103_v29  ;;  %v1163_v51 = vmul.f32 %v2108_v16, %v2108_v16  ;;  %v1164_v43 = vmul.f32 %v2113_v37, %v2113_v37  ;;  %v1165_v48 = vmul.f32 %v2118_v44, %v2118_v44 }
 0x20c   : > { %v1136_v39 = vadd.f32 %v1135_v40, %v2098_v1  ;;  %v1174_v33 = vadd.f32 %v1173_v21, %v1159_v24  ;;  %v1166_v42 = vmul.f32 %v2123_v0, %v2123_v0  ;;  %v1167_v63 = vmul.f32 %v2128_v12, %v2128_v12  ;;  %s1689_s9 = smov [#allocation8]   ;;  %s1223_s27 = sshll.u32 %s2242_s3, 4  ;;  %s1224_s27 = int_to_ptr.hbm [resolvable:$true] %s1223_s27 }
 0x20d   : > { %v1168_v54 = vmul.f32 %v2133_v28, %v2133_v28  ;;  %v1169_v20 = vmul.f32 %v2138_v9, %v2138_v9  ;;  %s1221_s26 = sshll.u32 %s1689_s9, 4  ;;  %s1690_s28 = smov [#allocation10]   ;;  %s1222_s26 = int_to_ptr.vmem [resolvable:$true] %s1221_s26 }
 0x20e   : > { %v1137_v38 = vadd.f32 %v1136_v39, %v2103_v29  ;;  %v1175_v41 = vadd.f32 %v1174_v33, %v1160_v45  ;;  %s1233_s6 = sshll.u32 %s1690_s28, 4  ;;  %s1235_s13 = sshll.u32 %s2243_s4, 4  ;;  %s1234_s6 = int_to_ptr.vmem [resolvable:$true] %s1233_s6  ;;  %s1236_s13 = int_to_ptr.hbm [resolvable:$true] %s1235_s13 }
 0x20f   : > { %p2251_p7 = scmp.eq.s32.totalorder %s1737_s19, 3 }
 0x210   : > { %v1138_v18 = vadd.f32 %v1137_v38, %v2108_v16  ;;  %v1176_v52 = vadd.f32 %v1175_v41, %v1161_v32 }
 0x211   : > { %p2252_p13 = pmov %p2251_p7  ;;  %p2253_p0 = pmov %p2251_p7 }
 0x212   : > { %v1139_v60 = vadd.f32 %v1138_v18, %v2113_v37  ;;  %v1177_v47 = vadd.f32 %v1176_v52, %v1162_v35 }
 0x214   : > { %v1140_v1 = vadd.f32 %v1139_v60, %v2118_v44  ;;  %v1178_v49 = vadd.f32 %v1177_v47, %v1163_v51 }
 0x216   : > { %v1141_v29 = vadd.f32 %v1140_v1, %v2123_v0  ;;  %v1179_v50 = vadd.f32 %v1178_v49, %v1164_v43 }
 0x218   : > { %v1142_v16 = vadd.f32 %v1141_v29, %v2128_v12  ;;  %v1180_v17 = vadd.f32 %v1179_v50, %v1165_v48 }
 0x21a   : > { %v1143_v37 = vadd.f32 %v1142_v16, %v2133_v28  ;;  %v1181_v10 = vadd.f32 %v1180_v17, %v1166_v42 }
 0x21c   : > { %v1144_v44 = vadd.f32 %v1143_v37, %v2138_v9  ;;  %v1182_v56 = vadd.f32 %v1181_v10, %v1167_v63 }
 0x21e   : > { %v1145_v0 = vrot.slane %v1144_v44, 4  ;;  %v1183_v59 = vadd.f32 %v1182_v56, %v1168_v54 }
 0x220   : > { %v1146_v57 = vadd.f32 %v1145_v0, %v1144_v44  ;;  %v1184_v13 = vadd.f32 %v1183_v59, %v1169_v20 }
 0x222   : > { %v1147_v58 = vrot.slane %v1146_v57, 2  ;;  %v1185_v61 = vrot.slane %v1184_v13, 4 }
 0x224   : > { %v1148_v12 = vadd.f32 %v1147_v58, %v1146_v57  ;;  %v1186_v62 = vadd.f32 %v1185_v61, %v1184_v13 }
 0x226   : > { %v1149_v8 = vrot.slane %v1148_v12, 1  ;;  %v1187_v6 = vrot.slane %v1186_v62, 2 }
 0x228   : > { %v1150_v28 = vadd.f32 %v1149_v8, %v1148_v12  ;;  %v1188_v31 = vadd.f32 %v1187_v6, %v1186_v62 }
 0x22a   : > { %v1151_v26 = vadd.f32 %v1150_v28, %v1129_v2  ;;  %v1189_v3 = vrot.slane %v1188_v31, 1 }
 0x22c   : > { %1152 = vst [vmem:[#allocation8] sm:$0x1] %v1151_v26  ;;  %v1190_v5 = vadd.f32 %v1189_v3, %v1188_v31 }
 0x22d   : > { %1419 = dma.vmem_to_hbm [thread:$0]  (%p2251_p7), %s1222_s26, 16, %s1224_s27, [#allocation9]  }
 0x22e   : > { %v1191_v27 = vadd.f32 %v1190_v5, %v1153_v4 }
 0x230   : > { %1192 = vst [vmem:[#allocation10] sm:$0x1] %v1191_v27 }
 0x231   : > { %1421 = dma.vmem_to_hbm [thread:$0]  (%p2252_p13), %s1234_s6, 16, %s1236_s13, [#allocation9]  }
 0x232   : > { %1658 = dma.done.wait (%p2253_p0), [#allocation9], 32   ;;  %p2254_p3 = pmov %p2253_p0 }
 0x234   : > { %1660 = vsyncadd (%p2254_p3), [#allocation9], 4294967264 }
 0x235 PF: > { %p1446_p5 = scmp.ge.s32.totalorder %s1679_s18, 2  ;;  %s1257_s14 = sand.u32 1, %s1667_s15  }
 0x236   : > { %s1258_s10 = scalar_lea.sflag [#allocation4], %s1257_s14 }
 0x237   : > { %p1436_p1 = pnand %p1446_p5, %p1751_p6 }
 0x239   : > { %p1437_p2 = pneg %p1436_p1 }
 0x23b   : > { %1662 = dma.done.wait (%p1437_p2), %s1258_s10, 2048  }
 0x23c   : > { %1664 = vsyncadd (%p1437_p2), %s1258_s10, 4294965248  ;;  %p20_p4 = scmp.ge.s32.totalorder %s1769_s29, 6   ;;  %s2255_s15 = smov %s1671_s16 }
 0x23d   : > { %s2256_s16 = smov %s1675_s17  ;;  %s2257_s17 = smov %s1779_s8 }
 0x23e   : > { %s2258_s18 = smov %s1769_s29  ;;  %22 = sbr.rel (!%p20_p4) target bundleno = 7 (0x7), region = 97 }
 0x243   :  { %1264 = vsyncpa [#allocation3], 1 }
 0x244   :  { %1266 = vsyncpa [#allocation3 + $0x1], 1 }
 0x245   :  { %1267 = vsyncpa [#allocation6], 1 }
 0x246   :  { %1268 = vsyncpa [#allocation4], 1 }
 0x247   :  { %1270 = vsyncpa [#allocation4 + $0x1], 1 }
 0x248   :  { %1271 = vsyncpa [#allocation9], 1 }

</bundles_post_ra>
